<compile_context>
chip_gen: v6e
topology: v6e:2x2x1
jax: 0.10.0
libtpu: 0.0.40
codegen_flags: <defaults>
</compile_context>

<pallas_src>
import functools
import math

import jax
import jax.numpy as jnp
from jax.experimental import pallas as pl
from jax.experimental.pallas import tpu as pltpu

# -------------------- small config consistent with the module ---------------
B = 2
T = 3            # window_length
C_IN = 1         # n_input_channels
H = 16
W = 16
P = 8            # patch_size
D_MODEL = 32     # hidden_channels
N_HEADS = 4
DEPTH = 2
N_OUT = 1        # n_output_channels

NPH = H // P
NPW = W // P
NUM_PATCHES = NPH * NPW
SEQ = T * NUM_PATCHES          # 12 real tokens
FF = 4 * D_MODEL

# rows of the packed per-layer vector operand [DEPTH, VEC_ROWS, D]
ROW_BQ, ROW_BK, ROW_BV, ROW_BO, ROW_B2 = 0, 1, 2, 3, 4
ROW_LN1W, ROW_LN1B, ROW_LN2W, ROW_LN2B = 5, 6, 7, 8
VEC_ROWS = 16                  # sublane-friendly packing (rows 9..15 unused)

_SQRT_HALF = 0.7071067811865476


# ------------------------------ kernel helpers -------------------------------
def _layernorm(x, w, b, eps=1e-5):
    mu = jnp.mean(x, axis=-1, keepdims=True)
    var = jnp.mean((x - mu) ** 2, axis=-1, keepdims=True)
    return (x - mu) * jax.lax.rsqrt(var + eps) * w + b


def _erf_poly(z):
    # Abramowitz & Stegun 7.1.26: max abs error 1.5e-7 (exp/mul/add only).
    a1, a2, a3, a4, a5 = 0.254829592, -0.284496736, 1.421413741, -1.453152027, 1.061405429
    pc = 0.3275911
    az = jnp.abs(z)
    t = 1.0 / (1.0 + pc * az)
    poly = ((((a5 * t + a4) * t + a3) * t + a2) * t + a1) * t
    y = 1.0 - poly * jnp.exp(-az * az)
    return jnp.where(z >= 0, y, -y)


def _gelu_erf(x):
    # PyTorch F.gelu default (exact erf GELU), to ~1.5e-7.
    return 0.5 * x * (1.0 + _erf_poly(x * _SQRT_HALF))


# ------------------------------ fused Pallas kernel ---------------------------
def _fused_vit_kernel(
    patches_ref, wpe_ref, pos_ref,
    wqkv_ref, wo_ref, w1_ref, w2_ref, vec_ref, b1_ref,
    decw_ref, decb_ref,
    o_ref,
    *, n_heads, depth, seq_real, n_frames, num_patches):
    """One batch element per grid step; everything VMEM-resident, 2-D ops only."""
    S, D = pos_ref.shape                     # S = padded token count (multiple of 8)
    hd = D // n_heads
    scale = 1.0 / math.sqrt(hd)

    # --- patch embedding (bf16 MXU, f32 acc) + positional (patch bias folded in) ---
    x = jnp.dot(patches_ref[...], wpe_ref[...],
                preferred_element_type=jnp.float32) + pos_ref[...]        # [S, D] f32

    # additive key-padding mask: real keys -> 0, padded keys -> -1e9
    key_pos = jax.lax.broadcasted_iota(jnp.int32, (S, S), 1)
    key_bias = jnp.where(key_pos < seq_real, 0.0, -1e9).astype(jnp.float32)

    # --- DEPTH post-norm nn.TransformerEncoderLayer (MHA + erf-GELU FFN) ---
    for l in range(depth):
        xb = x.astype(jnp.bfloat16)
        vec_l = vec_ref[l]                                               # [16, D] f32

        q = (jnp.dot(xb, wqkv_ref[l, 0], preferred_element_type=jnp.float32)
             + vec_l[ROW_BQ:ROW_BQ + 1, :])
        k = (jnp.dot(xb, wqkv_ref[l, 1], preferred_element_type=jnp.float32)
             + vec_l[ROW_BK:ROW_BK + 1, :])
        v = (jnp.dot(xb, wqkv_ref[l, 2], preferred_element_type=jnp.float32)
             + vec_l[ROW_BV:ROW_BV + 1, :])

        # per-head attention with 2-D ops only; single Wo matmul on concat(heads)
        heads = []
        for h in range(n_heads):
            sl = slice(h * hd, (h + 1) * hd)
            qh = q[:, sl].astype(jnp.bfloat16)
            kh = k[:, sl].astype(jnp.bfloat16)
            vh = v[:, sl].astype(jnp.bfloat16)
            s = (jnp.einsum('qd,kd->qk', qh, kh,
                            preferred_element_type=jnp.float32) * scale + key_bias)
            s = s - jnp.max(s, axis=-1, keepdims=True)
            e = jnp.exp(s)
            p = e * pl.reciprocal(jnp.sum(e, axis=-1, keepdims=True), approx=True)
            heads.append(jnp.dot(p.astype(jnp.bfloat16), vh,
                                 preferred_element_type=jnp.float32))
        ctx = jnp.concatenate(heads, axis=-1)                            # [S, D]
        attn = (jnp.dot(ctx.astype(jnp.bfloat16), wo_ref[l],
                        preferred_element_type=jnp.float32)
                + vec_l[ROW_BO:ROW_BO + 1, :])

        # post-norm: y = LN1(x + MHA(x)); x = LN2(y + FFN(y))
        y = _layernorm(x + attn,
                       vec_l[ROW_LN1W:ROW_LN1W + 1, :],
                       vec_l[ROW_LN1B:ROW_LN1B + 1, :])
        h1 = (jnp.dot(y.astype(jnp.bfloat16), w1_ref[l],
                      preferred_element_type=jnp.float32) + b1_ref[l])
        h1 = _gelu_erf(h1)
        ff = (jnp.dot(h1.astype(jnp.bfloat16), w2_ref[l],
                      preferred_element_type=jnp.float32)
              + vec_l[ROW_B2:ROW_B2 + 1, :])
        x = _layernorm(y + ff,
                       vec_l[ROW_LN2W:ROW_LN2W + 1, :],
                       vec_l[ROW_LN2B:ROW_LN2B + 1, :])

    # --- decode last real frame's tokens (final 1x1 conv already folded in) ---
    last = x[(n_frames - 1) * num_patches:n_frames * num_patches, :]     # [NP, D]
    dec = (jnp.dot(last.astype(jnp.bfloat16), decw_ref[...],
                   preferred_element_type=jnp.float32) + decb_ref[...])  # [NP, P*P]
    o_ref[...] = dec


# ------------------------------- forward pass --------------------------------
def spatiotemporal_vit_forward(x, params):
    Bv, Tv, Cv, Hv, Wv = x.shape
    nph, npw = Hv // P, Wv // P
    npatches = nph * npw
    seq_real = Tv * npatches
    s_pad = ((seq_real + 7) // 8) * 8                 # sublane-aligned token count
    D = D_MODEL
    patch_dim = Cv * P * P

    # im2col for Conv2d(kernel=P, stride=P); token order (t, ph, pw) matches PyTorch
    patches = x.reshape(Bv, Tv, Cv, nph, P, npw, P).transpose(0, 1, 3, 5, 2, 4, 6)
    patches = patches.reshape(Bv, seq_real, patch_dim)
    patches = jnp.pad(patches, ((0, 0), (0, s_pad - seq_real), (0, 0)))
    patches = patches.astype(jnp.bfloat16)

    w_pe = params['patch_w'].reshape(D, patch_dim).T.astype(jnp.bfloat16)

    # combined positional tensor: temporal + spatial + patch-embed bias (padded rows = 0)
    pos = (params['temporal_pos'][0][:, None, :]
           + params['spatial_pos'][0][None, :, :]).reshape(seq_real, D)
    pos = pos + params['patch_b'].reshape(1, D)
    pos = jnp.pad(pos, ((0, s_pad - seq_real), (0, 0))).astype(jnp.float32)

    # fold the final 1x1 conv (C_in = C_out = 1 => scalar scale + shift) into the decoder
    cw = params['conv_w'][0, 0]
    cb = params['conv_b'][0, 0]
    dec_w = (params['dec_w'] * cw).astype(jnp.bfloat16)
    dec_b = (params['dec_b'] * cw + cb).astype(jnp.float32)

    L = params['layers']
    wqkv = L['wqkv'].astype(jnp.bfloat16)
    wo = L['wo'].astype(jnp.bfloat16)
    w1 = L['w1'].astype(jnp.bfloat16)
    w2 = L['w2'].astype(jnp.bfloat16)
    vec = L['vec']
    b1 = L['b1']
    depth = wqkv.shape[0]

    kernel = functools.partial(
        _fused_vit_kernel, n_heads=N_HEADS, depth=depth, seq_real=seq_real,
        n_frames=Tv, num_patches=npatches)

    vmem = pltpu.MemorySpace.VMEM
    out = pl.pallas_call(
        kernel,
        grid=(Bv,),
        in_specs=[
            pl.BlockSpec((None, s_pad, patch_dim), lambda b: (b, 0, 0), memory_space=vmem),
            pl.BlockSpec((patch_dim, D), lambda b: (0, 0), memory_space=vmem),
            pl.BlockSpec((s_pad, D), lambda b: (0, 0), memory_space=vmem),
            pl.BlockSpec((depth, 3, D, D), lambda b: (0, 0, 0, 0), memory_space=vmem),
            pl.BlockSpec((depth, D, D), lambda b: (0, 0, 0), memory_space=vmem),
            pl.BlockSpec((depth, D, FF), lambda b: (0, 0, 0), memory_space=vmem),
            pl.BlockSpec((depth, FF, D), lambda b: (0, 0, 0), memory_space=vmem),
            pl.BlockSpec((depth, VEC_ROWS, D), lambda b: (0, 0, 0), memory_space=vmem),
            pl.BlockSpec((depth, 1, FF), lambda b: (0, 0, 0), memory_space=vmem),
            pl.BlockSpec((D, P * P), lambda b: (0, 0), memory_space=vmem),
            pl.BlockSpec((1, P * P), lambda b: (0, 0), memory_space=vmem),
        ],
        out_specs=pl.BlockSpec((None, npatches, P * P), lambda b: (b, 0, 0),
                               memory_space=vmem),
        out_shape=jax.ShapeDtypeStruct((Bv, npatches, P * P), jnp.float32),
        compiler_params=pltpu.CompilerParams(dimension_semantics=("parallel",)),
    )(patches, w_pe, pos, wqkv, wo, w1, w2, vec, b1, dec_w, dec_b)

    # un-patchify (pure layout glue): [B, NP, P*P] -> [B, 1, H, W]
    dec = out.reshape(Bv, nph, npw, P, P).transpose(0, 1, 3, 2, 4)
    return dec.reshape(Bv, N_OUT, Hv, Wv)


# -------------------- pure-JAX (f32) reference for validation ----------------
def _reference_forward(x, params):
    Bv, Tv, Cv, Hv, Wv = x.shape
    nph, npw = Hv // P, Wv // P
    npatches = nph * npw
    D = D_MODEL
    hd = D // N_HEADS

    pw = params['patch_w'].reshape(D, Cv * P * P)
    patches = x.reshape(Bv, Tv, Cv, nph, P, npw, P).transpose(0, 1, 3, 5, 2, 4, 6)
    patches = patches.reshape(Bv, Tv * npatches, Cv * P * P)
    tok = patches @ pw.T + params['patch_b']
    pos = (params['temporal_pos'][0][:, None, :]
           + params['spatial_pos'][0][None, :, :]).reshape(Tv * npatches, D)
    tok = tok + pos

    L = params['layers']
    for l in range(DEPTH):
        v_l = L['vec'][l]
        q = tok @ L['wqkv'][l, 0] + v_l[ROW_BQ]
        k = tok @ L['wqkv'][l, 1] + v_l[ROW_BK]
        v = tok @ L['wqkv'][l, 2] + v_l[ROW_BV]
        qh = q.reshape(Bv, -1, N_HEADS, hd).transpose(0, 2, 1, 3)
        kh = k.reshape(Bv, -1, N_HEADS, hd).transpose(0, 2, 1, 3)
        vh = v.reshape(Bv, -1, N_HEADS, hd).transpose(0, 2, 1, 3)
        s = jnp.einsum('bhqd,bhkd->bhqk', qh, kh) / math.sqrt(hd)
        p = jax.nn.softmax(s, axis=-1)
        ctx = jnp.einsum('bhqk,bhkd->bhqd', p, vh)
        ctx = ctx.transpose(0, 2, 1, 3).reshape(Bv, -1, D)
        attn = ctx @ L['wo'][l] + v_l[ROW_BO]
        y = _layernorm(tok + attn, v_l[ROW_LN1W], v_l[ROW_LN1B])
        h1 = jax.nn.gelu(y @ L['w1'][l] + L['b1'][l, 0], approximate=False)
        ff = h1 @ L['w2'][l] + v_l[ROW_B2]
        tok = _layernorm(y + ff, v_l[ROW_LN2W], v_l[ROW_LN2B])

    last = tok[:, (Tv - 1) * npatches:, :]
    dec = last @ params['dec_w'] + params['dec_b']
    dec = dec.reshape(Bv, nph, npw, P, P).transpose(0, 1, 3, 2, 4).reshape(Bv, 1, Hv, Wv)
    return params['conv_w'][0, 0] * dec + params['conv_b'][0, 0]


# ------------------------ deterministic parameter init -----------------------
def init_params(key):
    keys = jax.random.split(key, 6 + DEPTH)
    s = 0.05

    def nrm(k, shape):
        return s * jax.random.normal(k, shape, jnp.float32)

    params = {
        'patch_w': nrm(keys[0], (D_MODEL, C_IN, P, P)),
        'patch_b': nrm(keys[1], (D_MODEL,)),
        'spatial_pos': jax.random.normal(keys[2], (1, NUM_PATCHES, D_MODEL), jnp.float32),
        'temporal_pos': jax.random.normal(keys[3], (1, T, D_MODEL), jnp.float32),
        'dec_w': nrm(keys[4], (D_MODEL, P * P)),
        'dec_b': nrm(keys[5], (1, P * P)),
        'conv_w': jnp.full((1, 1), 0.7, jnp.float32),
        'conv_b': jnp.full((1, 1), 0.1, jnp.float32),
    }

    wqkv, wo, w1, w2, b1, vec = [], [], [], [], [], []
    for l in range(DEPTH):
        lk = jax.random.split(keys[6 + l], 6)
        wqkv.append(jnp.stack([nrm(lk[0], (D_MODEL, D_MODEL)),
                               nrm(lk[1], (D_MODEL, D_MODEL)),
                               nrm(lk[2], (D_MODEL, D_MODEL))]))      # [3, D, D]
        wo.append(nrm(lk[3], (D_MODEL, D_MODEL)))
        w1.append(nrm(lk[4], (D_MODEL, FF)))
        w2.append(nrm(lk[5], (FF, D_MODEL)))
        b1.append(jnp.zeros((1, FF), jnp.float32))
        v = jnp.zeros((VEC_ROWS, D_MODEL), jnp.float32)               # linear biases = 0
        v = v.at[ROW_LN1W].set(1.0).at[ROW_LN2W].set(1.0)             # LN weight=1, bias=0
        vec.append(v)

    params['layers'] = dict(
        wqkv=jnp.stack(wqkv), wo=jnp.stack(wo), w1=jnp.stack(w1), w2=jnp.stack(w2),
        b1=jnp.stack(b1), vec=jnp.stack(vec))
    return params


if __name__ == "__main__":
    key = jax.random.PRNGKey(0)
    pkey, xkey = jax.random.split(key)
    params = init_params(pkey)
    x = jax.random.normal(xkey, (B, T, C_IN, H, W), jnp.float32)

    out = jax.jit(spatiotemporal_vit_forward)(x, params)
    out = jax.block_until_ready(out)

    assert out.shape == (B, N_OUT, H, W), out.shape
    assert bool(jnp.all(jnp.isfinite(out)))

    # loose tolerance: bf16 matmul operands + approx softmax reciprocal vs f32 reference
    ref = jax.jit(_reference_forward)(x, params)
    max_err = float(jnp.max(jnp.abs(out - ref)))
    assert max_err < 5e-2, f"max abs err vs reference: {max_err}"

    print("KERNEL_OK")
</pallas_src>

<mosaic_0001>
module attributes {stable_mosaic.version = 11 : i64} {
  func.func @_fused_vit_kernel(%arg0: i32, %arg1: memref<1x16x64xbf16, #tpu.memory_space<vmem>>, %arg2: memref<64x32xbf16, #tpu.memory_space<vmem>>, %arg3: memref<16x32xf32, #tpu.memory_space<vmem>>, %arg4: memref<2x3x32x32xbf16, #tpu.memory_space<vmem>>, %arg5: memref<2x32x32xbf16, #tpu.memory_space<vmem>>, %arg6: memref<2x32x128xbf16, #tpu.memory_space<vmem>>, %arg7: memref<2x128x32xbf16, #tpu.memory_space<vmem>>, %arg8: memref<2x16x32xf32, #tpu.memory_space<vmem>>, %arg9: memref<2x1x128xf32, #tpu.memory_space<vmem>>, %arg10: memref<32x64xbf16, #tpu.memory_space<vmem>>, %arg11: memref<1x64xf32, #tpu.memory_space<vmem>>, %arg12: memref<1x4x64xf32, #tpu.memory_space<vmem>>) attributes {dimension_semantics = [#tpu.dimension_semantics<parallel>], iteration_bounds = array<i64: 2>, scalar_prefetch = 0 : i64, scratch_operands = 0 : i64, tpu.core_type = #tpu.core_type<tc>, window_params = [{transform_indices = @transform_0, window_bounds = array<i64: 1, 16, 64>}, {pipeline_mode = #tpu.pipeline_mode<synchronous>, transform_indices = @transform_1, window_bounds = array<i64: 64, 32>}, {pipeline_mode = #tpu.pipeline_mode<synchronous>, transform_indices = @transform_2, window_bounds = array<i64: 16, 32>}, {pipeline_mode = #tpu.pipeline_mode<synchronous>, transform_indices = @transform_3, window_bounds = array<i64: 2, 3, 32, 32>}, {pipeline_mode = #tpu.pipeline_mode<synchronous>, transform_indices = @transform_4, window_bounds = array<i64: 2, 32, 32>}, {pipeline_mode = #tpu.pipeline_mode<synchronous>, transform_indices = @transform_5, window_bounds = array<i64: 2, 32, 128>}, {pipeline_mode = #tpu.pipeline_mode<synchronous>, transform_indices = @transform_6, window_bounds = array<i64: 2, 128, 32>}, {pipeline_mode = #tpu.pipeline_mode<synchronous>, transform_indices = @transform_7, window_bounds = array<i64: 2, 16, 32>}, {pipeline_mode = #tpu.pipeline_mode<synchronous>, transform_indices = @transform_8, window_bounds = array<i64: 2, 1, 128>}, {pipeline_mode = #tpu.pipeline_mode<synchronous>, transform_indices = @transform_9, window_bounds = array<i64: 32, 64>}, {pipeline_mode = #tpu.pipeline_mode<synchronous>, transform_indices = @transform_10, window_bounds = array<i64: 1, 64>}, {transform_indices = @transform_11, window_bounds = array<i64: 1, 4, 64>}]} {
    %c0 = arith.constant 0 : index
    %c0_0 = arith.constant 0 : index
    %c0_1 = arith.constant 0 : index
    %0 = vector.load %arg1[%c0, %c0_0, %c0_1] : memref<1x16x64xbf16, #tpu.memory_space<vmem>>, vector<1x16x64xbf16>
    %1 = vector.shape_cast %0 : vector<1x16x64xbf16> to vector<16x64xbf16>
    %c0_2 = arith.constant 0 : index
    %c0_3 = arith.constant 0 : index
    %2 = vector.load %arg2[%c0_2, %c0_3] : memref<64x32xbf16, #tpu.memory_space<vmem>>, vector<64x32xbf16>
    %cst = arith.constant dense<0.000000e+00> : vector<16x32xf32>
    %3 = tpu.matmul %1, %2, %cst {dimension_numbers = #tpu.dot_dimension_numbers<[1], [0], [0], [1], [0, 0, 1, 1], [], []>} : vector<16x64xbf16>, vector<64x32xbf16>, vector<16x32xf32> -> vector<16x32xf32>
    %c0_4 = arith.constant 0 : index
    %c0_5 = arith.constant 0 : index
    %4 = vector.load %arg3[%c0_4, %c0_5] : memref<16x32xf32, #tpu.memory_space<vmem>>, vector<16x32xf32>
    %5 = arith.addf %3, %4 : vector<16x32xf32>
    %6 = tpu.iota {dimensions = array<i32: 1>} : vector<16x16xi32>
    %c12_i32 = arith.constant 12 : i32
    %7 = vector.broadcast %c12_i32 : i32 to vector<16x16xi32>
    %8 = arith.cmpi slt, %6, %7 : vector<16x16xi32>
    %cst_6 = arith.constant 0.000000e+00 : f32
    %cst_7 = arith.constant -1.000000e+09 : f32
    %9 = vector.broadcast %cst_6 : f32 to vector<16x16xf32>
    %10 = vector.broadcast %cst_7 : f32 to vector<16x16xf32>
    %11 = arith.select %8, %9, %10 : vector<16x16xi1>, vector<16x16xf32>
    %12 = arith.truncf %5 : vector<16x32xf32> to vector<16x32xbf16>
    %c0_8 = arith.constant 0 : index
    %c0_9 = arith.constant 0 : index
    %c0_10 = arith.constant 0 : index
    %13 = vector.load %arg8[%c0_8, %c0_9, %c0_10] : memref<2x16x32xf32, #tpu.memory_space<vmem>>, vector<1x16x32xf32>
    %14 = vector.shape_cast %13 : vector<1x16x32xf32> to vector<16x32xf32>
    %c0_11 = arith.constant 0 : index
    %c0_12 = arith.constant 0 : index
    %c0_13 = arith.constant 0 : index
    %c0_14 = arith.constant 0 : index
    %15 = vector.load %arg4[%c0_11, %c0_12, %c0_13, %c0_14] : memref<2x3x32x32xbf16, #tpu.memory_space<vmem>>, vector<1x1x32x32xbf16>
    %16 = vector.shape_cast %15 : vector<1x1x32x32xbf16> to vector<32x32xbf16>
    %cst_15 = arith.constant dense<0.000000e+00> : vector<16x32xf32>
    %17 = tpu.matmul %12, %16, %cst_15 {dimension_numbers = #tpu.dot_dimension_numbers<[1], [0], [0], [1], [0, 0, 1, 1], [], []>} : vector<16x32xbf16>, vector<32x32xbf16>, vector<16x32xf32> -> vector<16x32xf32>
    %18 = vector.extract_strided_slice %14 {offsets = [0, 0], sizes = [1, 32], strides = [1, 1]} : vector<16x32xf32> to vector<1x32xf32>
    %19 = vector.broadcast %18 : vector<1x32xf32> to vector<16x32xf32>
    %20 = arith.addf %17, %19 : vector<16x32xf32>
    %c0_16 = arith.constant 0 : index
    %c1 = arith.constant 1 : index
    %c0_17 = arith.constant 0 : index
    %c0_18 = arith.constant 0 : index
    %21 = vector.load %arg4[%c0_16, %c1, %c0_17, %c0_18] : memref<2x3x32x32xbf16, #tpu.memory_space<vmem>>, vector<1x1x32x32xbf16>
    %22 = vector.shape_cast %21 : vector<1x1x32x32xbf16> to vector<32x32xbf16>
    %cst_19 = arith.constant dense<0.000000e+00> : vector<16x32xf32>
    %23 = tpu.matmul %12, %22, %cst_19 {dimension_numbers = #tpu.dot_dimension_numbers<[1], [0], [0], [1], [0, 0, 1, 1], [], []>} : vector<16x32xbf16>, vector<32x32xbf16>, vector<16x32xf32> -> vector<16x32xf32>
    %24 = vector.extract_strided_slice %14 {offsets = [1, 0], sizes = [1, 32], strides = [1, 1]} : vector<16x32xf32> to vector<1x32xf32>
    %25 = vector.broadcast %24 : vector<1x32xf32> to vector<16x32xf32>
    %26 = arith.addf %23, %25 : vector<16x32xf32>
    %c0_20 = arith.constant 0 : index
    %c2 = arith.constant 2 : index
    %c0_21 = arith.constant 0 : index
    %c0_22 = arith.constant 0 : index
    %27 = vector.load %arg4[%c0_20, %c2, %c0_21, %c0_22] : memref<2x3x32x32xbf16, #tpu.memory_space<vmem>>, vector<1x1x32x32xbf16>
    %28 = vector.shape_cast %27 : vector<1x1x32x32xbf16> to vector<32x32xbf16>
    %cst_23 = arith.constant dense<0.000000e+00> : vector<16x32xf32>
    %29 = tpu.matmul %12, %28, %cst_23 {dimension_numbers = #tpu.dot_dimension_numbers<[1], [0], [0], [1], [0, 0, 1, 1], [], []>} : vector<16x32xbf16>, vector<32x32xbf16>, vector<16x32xf32> -> vector<16x32xf32>
    %30 = vector.extract_strided_slice %14 {offsets = [2, 0], sizes = [1, 32], strides = [1, 1]} : vector<16x32xf32> to vector<1x32xf32>
    %31 = vector.broadcast %30 : vector<1x32xf32> to vector<16x32xf32>
    %32 = arith.addf %29, %31 : vector<16x32xf32>
    %33 = vector.extract_strided_slice %20 {offsets = [0, 0], sizes = [16, 8], strides = [1, 1]} : vector<16x32xf32> to vector<16x8xf32>
    %34 = arith.truncf %33 : vector<16x8xf32> to vector<16x8xbf16>
    %35 = vector.extract_strided_slice %26 {offsets = [0, 0], sizes = [16, 8], strides = [1, 1]} : vector<16x32xf32> to vector<16x8xf32>
    %36 = arith.truncf %35 : vector<16x8xf32> to vector<16x8xbf16>
    %37 = vector.extract_strided_slice %32 {offsets = [0, 0], sizes = [16, 8], strides = [1, 1]} : vector<16x32xf32> to vector<16x8xf32>
    %38 = arith.truncf %37 : vector<16x8xf32> to vector<16x8xbf16>
    "tpu.trace_start"() <{level = 10 : i32, message = "qd,kd->qk"}> : () -> ()
    %cst_24 = arith.constant dense<0.000000e+00> : vector<16x16xf32>
    %39 = tpu.matmul %34, %36, %cst_24 {dimension_numbers = #tpu.dot_dimension_numbers<[1], [1], [0], [0], [0, 0, 1, 0], [], []>} : vector<16x8xbf16>, vector<16x8xbf16>, vector<16x16xf32> -> vector<16x16xf32>
    "tpu.trace_stop"() : () -> ()
    %cst_25 = arith.constant 0.353553385 : f32
    %40 = vector.broadcast %cst_25 : f32 to vector<16x16xf32>
    %41 = arith.mulf %39, %40 : vector<16x16xf32>
    %42 = arith.addf %41, %11 : vector<16x16xf32>
    %cst_26 = arith.constant dense<0xFF800000> : vector<16xf32>
    %43 = vector.multi_reduction <maximumf>, %42, %cst_26 [1] : vector<16x16xf32> to vector<16xf32>
    %44 = vector.shape_cast %43 : vector<16xf32> to vector<16x1xf32>
    %45 = vector.broadcast %44 : vector<16x1xf32> to vector<16x16xf32>
    %46 = arith.subf %42, %45 : vector<16x16xf32>
    %47 = math.exp %46 : vector<16x16xf32>
    %cst_27 = arith.constant dense<0.000000e+00> : vector<16xf32>
    %48 = vector.multi_reduction <add>, %47, %cst_27 [1] : vector<16x16xf32> to vector<16xf32>
    %49 = vector.shape_cast %48 : vector<16xf32> to vector<16x1xf32>
    %50 = tpu.reciprocal %49 {approx = true} : vector<16x1xf32> -> vector<16x1xf32>
    %51 = vector.broadcast %50 : vector<16x1xf32> to vector<16x16xf32>
    %52 = arith.mulf %47, %51 : vector<16x16xf32>
    %53 = arith.truncf %52 : vector<16x16xf32> to vector<16x16xbf16>
    %cst_28 = arith.constant dense<0.000000e+00> : vector<16x8xf32>
    %54 = tpu.matmul %53, %38, %cst_28 {dimension_numbers = #tpu.dot_dimension_numbers<[1], [0], [0], [1], [0, 0, 1, 1], [], []>} : vector<16x16xbf16>, vector<16x8xbf16>, vector<16x8xf32> -> vector<16x8xf32>
    %55 = vector.extract_strided_slice %20 {offsets = [0, 8], sizes = [16, 8], strides = [1, 1]} : vector<16x32xf32> to vector<16x8xf32>
    %56 = arith.truncf %55 : vector<16x8xf32> to vector<16x8xbf16>
    %57 = vector.extract_strided_slice %26 {offsets = [0, 8], sizes = [16, 8], strides = [1, 1]} : vector<16x32xf32> to vector<16x8xf32>
    %58 = arith.truncf %57 : vector<16x8xf32> to vector<16x8xbf16>
    %59 = vector.extract_strided_slice %32 {offsets = [0, 8], sizes = [16, 8], strides = [1, 1]} : vector<16x32xf32> to vector<16x8xf32>
    %60 = arith.truncf %59 : vector<16x8xf32> to vector<16x8xbf16>
    "tpu.trace_start"() <{level = 10 : i32, message = "qd,kd->qk"}> : () -> ()
    %cst_29 = arith.constant dense<0.000000e+00> : vector<16x16xf32>
    %61 = tpu.matmul %56, %58, %cst_29 {dimension_numbers = #tpu.dot_dimension_numbers<[1], [1], [0], [0], [0, 0, 1, 0], [], []>} : vector<16x8xbf16>, vector<16x8xbf16>, vector<16x16xf32> -> vector<16x16xf32>
    "tpu.trace_stop"() : () -> ()
    %cst_30 = arith.constant 0.353553385 : f32
    %62 = vector.broadcast %cst_30 : f32 to vector<16x16xf32>
    %63 = arith.mulf %61, %62 : vector<16x16xf32>
    %64 = arith.addf %63, %11 : vector<16x16xf32>
    %cst_31 = arith.constant dense<0xFF800000> : vector<16xf32>
    %65 = vector.multi_reduction <maximumf>, %64, %cst_31 [1] : vector<16x16xf32> to vector<16xf32>
    %66 = vector.shape_cast %65 : vector<16xf32> to vector<16x1xf32>
    %67 = vector.broadcast %66 : vector<16x1xf32> to vector<16x16xf32>
    %68 = arith.subf %64, %67 : vector<16x16xf32>
    %69 = math.exp %68 : vector<16x16xf32>
    %cst_32 = arith.constant dense<0.000000e+00> : vector<16xf32>
    %70 = vector.multi_reduction <add>, %69, %cst_32 [1] : vector<16x16xf32> to vector<16xf32>
    %71 = vector.shape_cast %70 : vector<16xf32> to vector<16x1xf32>
    %72 = tpu.reciprocal %71 {approx = true} : vector<16x1xf32> -> vector<16x1xf32>
    %73 = vector.broadcast %72 : vector<16x1xf32> to vector<16x16xf32>
    %74 = arith.mulf %69, %73 : vector<16x16xf32>
    %75 = arith.truncf %74 : vector<16x16xf32> to vector<16x16xbf16>
    %cst_33 = arith.constant dense<0.000000e+00> : vector<16x8xf32>
    %76 = tpu.matmul %75, %60, %cst_33 {dimension_numbers = #tpu.dot_dimension_numbers<[1], [0], [0], [1], [0, 0, 1, 1], [], []>} : vector<16x16xbf16>, vector<16x8xbf16>, vector<16x8xf32> -> vector<16x8xf32>
    %77 = vector.extract_strided_slice %20 {offsets = [0, 16], sizes = [16, 8], strides = [1, 1]} : vector<16x32xf32> to vector<16x8xf32>
    %78 = arith.truncf %77 : vector<16x8xf32> to vector<16x8xbf16>
    %79 = vector.extract_strided_slice %26 {offsets = [0, 16], sizes = [16, 8], strides = [1, 1]} : vector<16x32xf32> to vector<16x8xf32>
    %80 = arith.truncf %79 : vector<16x8xf32> to vector<16x8xbf16>
    %81 = vector.extract_strided_slice %32 {offsets = [0, 16], sizes = [16, 8], strides = [1, 1]} : vector<16x32xf32> to vector<16x8xf32>
    %82 = arith.truncf %81 : vector<16x8xf32> to vector<16x8xbf16>
    "tpu.trace_start"() <{level = 10 : i32, message = "qd,kd->qk"}> : () -> ()
    %cst_34 = arith.constant dense<0.000000e+00> : vector<16x16xf32>
    %83 = tpu.matmul %78, %80, %cst_34 {dimension_numbers = #tpu.dot_dimension_numbers<[1], [1], [0], [0], [0, 0, 1, 0], [], []>} : vector<16x8xbf16>, vector<16x8xbf16>, vector<16x16xf32> -> vector<16x16xf32>
    "tpu.trace_stop"() : () -> ()
    %cst_35 = arith.constant 0.353553385 : f32
    %84 = vector.broadcast %cst_35 : f32 to vector<16x16xf32>
    %85 = arith.mulf %83, %84 : vector<16x16xf32>
    %86 = arith.addf %85, %11 : vector<16x16xf32>
    %cst_36 = arith.constant dense<0xFF800000> : vector<16xf32>
    %87 = vector.multi_reduction <maximumf>, %86, %cst_36 [1] : vector<16x16xf32> to vector<16xf32>
    %88 = vector.shape_cast %87 : vector<16xf32> to vector<16x1xf32>
    %89 = vector.broadcast %88 : vector<16x1xf32> to vector<16x16xf32>
    %90 = arith.subf %86, %89 : vector<16x16xf32>
    %91 = math.exp %90 : vector<16x16xf32>
    %cst_37 = arith.constant dense<0.000000e+00> : vector<16xf32>
    %92 = vector.multi_reduction <add>, %91, %cst_37 [1] : vector<16x16xf32> to vector<16xf32>
    %93 = vector.shape_cast %92 : vector<16xf32> to vector<16x1xf32>
    %94 = tpu.reciprocal %93 {approx = true} : vector<16x1xf32> -> vector<16x1xf32>
    %95 = vector.broadcast %94 : vector<16x1xf32> to vector<16x16xf32>
    %96 = arith.mulf %91, %95 : vector<16x16xf32>
    %97 = arith.truncf %96 : vector<16x16xf32> to vector<16x16xbf16>
    %cst_38 = arith.constant dense<0.000000e+00> : vector<16x8xf32>
    %98 = tpu.matmul %97, %82, %cst_38 {dimension_numbers = #tpu.dot_dimension_numbers<[1], [0], [0], [1], [0, 0, 1, 1], [], []>} : vector<16x16xbf16>, vector<16x8xbf16>, vector<16x8xf32> -> vector<16x8xf32>
    %99 = vector.extract_strided_slice %20 {offsets = [0, 24], sizes = [16, 8], strides = [1, 1]} : vector<16x32xf32> to vector<16x8xf32>
    %100 = arith.truncf %99 : vector<16x8xf32> to vector<16x8xbf16>
    %101 = vector.extract_strided_slice %26 {offsets = [0, 24], sizes = [16, 8], strides = [1, 1]} : vector<16x32xf32> to vector<16x8xf32>
    %102 = arith.truncf %101 : vector<16x8xf32> to vector<16x8xbf16>
    %103 = vector.extract_strided_slice %32 {offsets = [0, 24], sizes = [16, 8], strides = [1, 1]} : vector<16x32xf32> to vector<16x8xf32>
    %104 = arith.truncf %103 : vector<16x8xf32> to vector<16x8xbf16>
    "tpu.trace_start"() <{level = 10 : i32, message = "qd,kd->qk"}> : () -> ()
    %cst_39 = arith.constant dense<0.000000e+00> : vector<16x16xf32>
    %105 = tpu.matmul %100, %102, %cst_39 {dimension_numbers = #tpu.dot_dimension_numbers<[1], [1], [0], [0], [0, 0, 1, 0], [], []>} : vector<16x8xbf16>, vector<16x8xbf16>, vector<16x16xf32> -> vector<16x16xf32>
    "tpu.trace_stop"() : () -> ()
    %cst_40 = arith.constant 0.353553385 : f32
    %106 = vector.broadcast %cst_40 : f32 to vector<16x16xf32>
    %107 = arith.mulf %105, %106 : vector<16x16xf32>
    %108 = arith.addf %107, %11 : vector<16x16xf32>
    %cst_41 = arith.constant dense<0xFF800000> : vector<16xf32>
    %109 = vector.multi_reduction <maximumf>, %108, %cst_41 [1] : vector<16x16xf32> to vector<16xf32>
    %110 = vector.shape_cast %109 : vector<16xf32> to vector<16x1xf32>
    %111 = vector.broadcast %110 : vector<16x1xf32> to vector<16x16xf32>
    %112 = arith.subf %108, %111 : vector<16x16xf32>
    %113 = math.exp %112 : vector<16x16xf32>
    %cst_42 = arith.constant dense<0.000000e+00> : vector<16xf32>
    %114 = vector.multi_reduction <add>, %113, %cst_42 [1] : vector<16x16xf32> to vector<16xf32>
    %115 = vector.shape_cast %114 : vector<16xf32> to vector<16x1xf32>
    %116 = tpu.reciprocal %115 {approx = true} : vector<16x1xf32> -> vector<16x1xf32>
    %117 = vector.broadcast %116 : vector<16x1xf32> to vector<16x16xf32>
    %118 = arith.mulf %113, %117 : vector<16x16xf32>
    %119 = arith.truncf %118 : vector<16x16xf32> to vector<16x16xbf16>
    %cst_43 = arith.constant dense<0.000000e+00> : vector<16x8xf32>
    %120 = tpu.matmul %119, %104, %cst_43 {dimension_numbers = #tpu.dot_dimension_numbers<[1], [0], [0], [1], [0, 0, 1, 1], [], []>} : vector<16x16xbf16>, vector<16x8xbf16>, vector<16x8xf32> -> vector<16x8xf32>
    %121 = tpu.concatenate %54, %76, %98, %120 in 1 : vector<16x8xf32>, vector<16x8xf32>, vector<16x8xf32>, vector<16x8xf32> -> vector<16x32xf32>
    %122 = arith.truncf %121 : vector<16x32xf32> to vector<16x32xbf16>
    %c0_44 = arith.constant 0 : index
    %c0_45 = arith.constant 0 : index
    %c0_46 = arith.constant 0 : index
    %123 = vector.load %arg5[%c0_44, %c0_45, %c0_46] : memref<2x32x32xbf16, #tpu.memory_space<vmem>>, vector<1x32x32xbf16>
    %124 = vector.shape_cast %123 : vector<1x32x32xbf16> to vector<32x32xbf16>
    %cst_47 = arith.constant dense<0.000000e+00> : vector<16x32xf32>
    %125 = tpu.matmul %122, %124, %cst_47 {dimension_numbers = #tpu.dot_dimension_numbers<[1], [0], [0], [1], [0, 0, 1, 1], [], []>} : vector<16x32xbf16>, vector<32x32xbf16>, vector<16x32xf32> -> vector<16x32xf32>
    %126 = vector.extract_strided_slice %14 {offsets = [3, 0], sizes = [1, 32], strides = [1, 1]} : vector<16x32xf32> to vector<1x32xf32>
    %127 = vector.broadcast %126 : vector<1x32xf32> to vector<16x32xf32>
    %128 = arith.addf %125, %127 : vector<16x32xf32>
    %129 = arith.addf %5, %128 : vector<16x32xf32>
    %130 = vector.extract_strided_slice %14 {offsets = [5, 0], sizes = [1, 32], strides = [1, 1]} : vector<16x32xf32> to vector<1x32xf32>
    %131 = vector.extract_strided_slice %14 {offsets = [6, 0], sizes = [1, 32], strides = [1, 1]} : vector<16x32xf32> to vector<1x32xf32>
    %cst_48 = arith.constant dense<0.000000e+00> : vector<16xf32>
    %132 = vector.multi_reduction <add>, %129, %cst_48 [1] : vector<16x32xf32> to vector<16xf32>
    %133 = vector.shape_cast %132 : vector<16xf32> to vector<16x1xf32>
    %cst_49 = arith.constant 3.200000e+01 : f32
    %134 = vector.broadcast %cst_49 : f32 to vector<16x1xf32>
    %135 = arith.divf %133, %134 : vector<16x1xf32>
    %136 = vector.broadcast %135 : vector<16x1xf32> to vector<16x32xf32>
    %137 = arith.subf %129, %136 : vector<16x32xf32>
    %138 = arith.mulf %137, %137 : vector<16x32xf32>
    %cst_50 = arith.constant dense<0.000000e+00> : vector<16xf32>
    %139 = vector.multi_reduction <add>, %138, %cst_50 [1] : vector<16x32xf32> to vector<16xf32>
    %140 = vector.shape_cast %139 : vector<16xf32> to vector<16x1xf32>
    %cst_51 = arith.constant 3.200000e+01 : f32
    %141 = vector.broadcast %cst_51 : f32 to vector<16x1xf32>
    %142 = arith.divf %140, %141 : vector<16x1xf32>
    %143 = vector.broadcast %135 : vector<16x1xf32> to vector<16x32xf32>
    %144 = arith.subf %129, %143 : vector<16x32xf32>
    %cst_52 = arith.constant 9.99999974E-6 : f32
    %145 = vector.broadcast %cst_52 : f32 to vector<16x1xf32>
    %146 = arith.addf %142, %145 : vector<16x1xf32>
    %147 = math.rsqrt %146 : vector<16x1xf32>
    %148 = vector.broadcast %147 : vector<16x1xf32> to vector<16x32xf32>
    %149 = arith.mulf %144, %148 : vector<16x32xf32>
    %150 = vector.broadcast %130 : vector<1x32xf32> to vector<16x32xf32>
    %151 = arith.mulf %149, %150 : vector<16x32xf32>
    %152 = vector.broadcast %131 : vector<1x32xf32> to vector<16x32xf32>
    %153 = arith.addf %151, %152 : vector<16x32xf32>
    %154 = arith.truncf %153 : vector<16x32xf32> to vector<16x32xbf16>
    %c0_53 = arith.constant 0 : index
    %c0_54 = arith.constant 0 : index
    %c0_55 = arith.constant 0 : index
    %155 = vector.load %arg6[%c0_53, %c0_54, %c0_55] : memref<2x32x128xbf16, #tpu.memory_space<vmem>>, vector<1x32x128xbf16>
    %156 = vector.shape_cast %155 : vector<1x32x128xbf16> to vector<32x128xbf16>
    %cst_56 = arith.constant dense<0.000000e+00> : vector<16x128xf32>
    %157 = tpu.matmul %154, %156, %cst_56 {dimension_numbers = #tpu.dot_dimension_numbers<[1], [0], [0], [1], [0, 0, 1, 1], [], []>} : vector<16x32xbf16>, vector<32x128xbf16>, vector<16x128xf32> -> vector<16x128xf32>
    %c0_57 = arith.constant 0 : index
    %c0_58 = arith.constant 0 : index
    %c0_59 = arith.constant 0 : index
    %158 = vector.load %arg9[%c0_57, %c0_58, %c0_59] : memref<2x1x128xf32, #tpu.memory_space<vmem>>, vector<1x1x128xf32>
    %159 = vector.shape_cast %158 : vector<1x1x128xf32> to vector<1x128xf32>
    %160 = vector.broadcast %159 : vector<1x128xf32> to vector<16x128xf32>
    %161 = arith.addf %157, %160 : vector<16x128xf32>
    %cst_60 = arith.constant 5.000000e-01 : f32
    %162 = vector.broadcast %cst_60 : f32 to vector<16x128xf32>
    %163 = arith.mulf %162, %161 : vector<16x128xf32>
    %cst_61 = arith.constant 0.707106769 : f32
    %164 = vector.broadcast %cst_61 : f32 to vector<16x128xf32>
    %165 = arith.mulf %161, %164 : vector<16x128xf32>
    %166 = math.absf %165 : vector<16x128xf32>
    %cst_62 = arith.constant 0.327591091 : f32
    %167 = vector.broadcast %cst_62 : f32 to vector<16x128xf32>
    %168 = arith.mulf %167, %166 : vector<16x128xf32>
    %cst_63 = arith.constant 1.000000e+00 : f32
    %169 = vector.broadcast %cst_63 : f32 to vector<16x128xf32>
    %170 = arith.addf %169, %168 : vector<16x128xf32>
    %cst_64 = arith.constant 1.000000e+00 : f32
    %171 = vector.broadcast %cst_64 : f32 to vector<16x128xf32>
    %172 = arith.divf %171, %170 : vector<16x128xf32>
    %cst_65 = arith.constant 1.06140542 : f32
    %173 = vector.broadcast %cst_65 : f32 to vector<16x128xf32>
    %174 = arith.mulf %173, %172 : vector<16x128xf32>
    %cst_66 = arith.constant -1.45315206 : f32
    %175 = vector.broadcast %cst_66 : f32 to vector<16x128xf32>
    %176 = arith.addf %174, %175 : vector<16x128xf32>
    %177 = arith.mulf %176, %172 : vector<16x128xf32>
    %cst_67 = arith.constant 1.42141378 : f32
    %178 = vector.broadcast %cst_67 : f32 to vector<16x128xf32>
    %179 = arith.addf %177, %178 : vector<16x128xf32>
    %180 = arith.mulf %179, %172 : vector<16x128xf32>
    %cst_68 = arith.constant -0.284496725 : f32
    %181 = vector.broadcast %cst_68 : f32 to vector<16x128xf32>
    %182 = arith.addf %180, %181 : vector<16x128xf32>
    %183 = arith.mulf %182, %172 : vector<16x128xf32>
    %cst_69 = arith.constant 0.254829586 : f32
    %184 = vector.broadcast %cst_69 : f32 to vector<16x128xf32>
    %185 = arith.addf %183, %184 : vector<16x128xf32>
    %186 = arith.mulf %185, %172 : vector<16x128xf32>
    %cst_70 = arith.constant 0.000000e+00 : f32
    %187 = vector.broadcast %cst_70 : f32 to vector<16x128xf32>
    %188 = arith.subf %187, %166 : vector<16x128xf32>
    %189 = arith.mulf %188, %166 : vector<16x128xf32>
    %190 = math.exp %189 : vector<16x128xf32>
    %191 = arith.mulf %186, %190 : vector<16x128xf32>
    %cst_71 = arith.constant 1.000000e+00 : f32
    %192 = vector.broadcast %cst_71 : f32 to vector<16x128xf32>
    %193 = arith.subf %192, %191 : vector<16x128xf32>
    %cst_72 = arith.constant 0.000000e+00 : f32
    %194 = vector.broadcast %cst_72 : f32 to vector<16x128xf32>
    %195 = arith.cmpf oge, %165, %194 : vector<16x128xf32>
    %cst_73 = arith.constant 0.000000e+00 : f32
    %196 = vector.broadcast %cst_73 : f32 to vector<16x128xf32>
    %197 = arith.subf %196, %193 : vector<16x128xf32>
    %198 = arith.select %195, %193, %197 : vector<16x128xi1>, vector<16x128xf32>
    %cst_74 = arith.constant 1.000000e+00 : f32
    %199 = vector.broadcast %cst_74 : f32 to vector<16x128xf32>
    %200 = arith.addf %199, %198 : vector<16x128xf32>
    %201 = arith.mulf %163, %200 : vector<16x128xf32>
    %202 = arith.truncf %201 : vector<16x128xf32> to vector<16x128xbf16>
    %c0_75 = arith.constant 0 : index
    %c0_76 = arith.constant 0 : index
    %c0_77 = arith.constant 0 : index
    %203 = vector.load %arg7[%c0_75, %c0_76, %c0_77] : memref<2x128x32xbf16, #tpu.memory_space<vmem>>, vector<1x128x32xbf16>
    %204 = vector.shape_cast %203 : vector<1x128x32xbf16> to vector<128x32xbf16>
    %cst_78 = arith.constant dense<0.000000e+00> : vector<16x32xf32>
    %205 = tpu.matmul %202, %204, %cst_78 {dimension_numbers = #tpu.dot_dimension_numbers<[1], [0], [0], [1], [0, 0, 1, 1], [], []>} : vector<16x128xbf16>, vector<128x32xbf16>, vector<16x32xf32> -> vector<16x32xf32>
    %206 = vector.extract_strided_slice %14 {offsets = [4, 0], sizes = [1, 32], strides = [1, 1]} : vector<16x32xf32> to vector<1x32xf32>
    %207 = vector.broadcast %206 : vector<1x32xf32> to vector<16x32xf32>
    %208 = arith.addf %205, %207 : vector<16x32xf32>
    %209 = arith.addf %153, %208 : vector<16x32xf32>
    %210 = vector.extract_strided_slice %14 {offsets = [7, 0], sizes = [1, 32], strides = [1, 1]} : vector<16x32xf32> to vector<1x32xf32>
    %211 = vector.extract_strided_slice %14 {offsets = [8, 0], sizes = [1, 32], strides = [1, 1]} : vector<16x32xf32> to vector<1x32xf32>
    %cst_79 = arith.constant dense<0.000000e+00> : vector<16xf32>
    %212 = vector.multi_reduction <add>, %209, %cst_79 [1] : vector<16x32xf32> to vector<16xf32>
    %213 = vector.shape_cast %212 : vector<16xf32> to vector<16x1xf32>
    %cst_80 = arith.constant 3.200000e+01 : f32
    %214 = vector.broadcast %cst_80 : f32 to vector<16x1xf32>
    %215 = arith.divf %213, %214 : vector<16x1xf32>
    %216 = vector.broadcast %215 : vector<16x1xf32> to vector<16x32xf32>
    %217 = arith.subf %209, %216 : vector<16x32xf32>
    %218 = arith.mulf %217, %217 : vector<16x32xf32>
    %cst_81 = arith.constant dense<0.000000e+00> : vector<16xf32>
    %219 = vector.multi_reduction <add>, %218, %cst_81 [1] : vector<16x32xf32> to vector<16xf32>
    %220 = vector.shape_cast %219 : vector<16xf32> to vector<16x1xf32>
    %cst_82 = arith.constant 3.200000e+01 : f32
    %221 = vector.broadcast %cst_82 : f32 to vector<16x1xf32>
    %222 = arith.divf %220, %221 : vector<16x1xf32>
    %223 = vector.broadcast %215 : vector<16x1xf32> to vector<16x32xf32>
    %224 = arith.subf %209, %223 : vector<16x32xf32>
    %cst_83 = arith.constant 9.99999974E-6 : f32
    %225 = vector.broadcast %cst_83 : f32 to vector<16x1xf32>
    %226 = arith.addf %222, %225 : vector<16x1xf32>
    %227 = math.rsqrt %226 : vector<16x1xf32>
    %228 = vector.broadcast %227 : vector<16x1xf32> to vector<16x32xf32>
    %229 = arith.mulf %224, %228 : vector<16x32xf32>
    %230 = vector.broadcast %210 : vector<1x32xf32> to vector<16x32xf32>
    %231 = arith.mulf %229, %230 : vector<16x32xf32>
    %232 = vector.broadcast %211 : vector<1x32xf32> to vector<16x32xf32>
    %233 = arith.addf %231, %232 : vector<16x32xf32>
    %234 = arith.truncf %233 : vector<16x32xf32> to vector<16x32xbf16>
    %c1_84 = arith.constant 1 : index
    %c0_85 = arith.constant 0 : index
    %c0_86 = arith.constant 0 : index
    %235 = vector.load %arg8[%c1_84, %c0_85, %c0_86] : memref<2x16x32xf32, #tpu.memory_space<vmem>>, vector<1x16x32xf32>
    %236 = vector.shape_cast %235 : vector<1x16x32xf32> to vector<16x32xf32>
    %c1_87 = arith.constant 1 : index
    %c0_88 = arith.constant 0 : index
    %c0_89 = arith.constant 0 : index
    %c0_90 = arith.constant 0 : index
    %237 = vector.load %arg4[%c1_87, %c0_88, %c0_89, %c0_90] : memref<2x3x32x32xbf16, #tpu.memory_space<vmem>>, vector<1x1x32x32xbf16>
    %238 = vector.shape_cast %237 : vector<1x1x32x32xbf16> to vector<32x32xbf16>
    %cst_91 = arith.constant dense<0.000000e+00> : vector<16x32xf32>
    %239 = tpu.matmul %234, %238, %cst_91 {dimension_numbers = #tpu.dot_dimension_numbers<[1], [0], [0], [1], [0, 0, 1, 1], [], []>} : vector<16x32xbf16>, vector<32x32xbf16>, vector<16x32xf32> -> vector<16x32xf32>
    %240 = vector.extract_strided_slice %236 {offsets = [0, 0], sizes = [1, 32], strides = [1, 1]} : vector<16x32xf32> to vector<1x32xf32>
    %241 = vector.broadcast %240 : vector<1x32xf32> to vector<16x32xf32>
    %242 = arith.addf %239, %241 : vector<16x32xf32>
    %c1_92 = arith.constant 1 : index
    %c1_93 = arith.constant 1 : index
    %c0_94 = arith.constant 0 : index
    %c0_95 = arith.constant 0 : index
    %243 = vector.load %arg4[%c1_92, %c1_93, %c0_94, %c0_95] : memref<2x3x32x32xbf16, #tpu.memory_space<vmem>>, vector<1x1x32x32xbf16>
    %244 = vector.shape_cast %243 : vector<1x1x32x32xbf16> to vector<32x32xbf16>
    %cst_96 = arith.constant dense<0.000000e+00> : vector<16x32xf32>
    %245 = tpu.matmul %234, %244, %cst_96 {dimension_numbers = #tpu.dot_dimension_numbers<[1], [0], [0], [1], [0, 0, 1, 1], [], []>} : vector<16x32xbf16>, vector<32x32xbf16>, vector<16x32xf32> -> vector<16x32xf32>
    %246 = vector.extract_strided_slice %236 {offsets = [1, 0], sizes = [1, 32], strides = [1, 1]} : vector<16x32xf32> to vector<1x32xf32>
    %247 = vector.broadcast %246 : vector<1x32xf32> to vector<16x32xf32>
    %248 = arith.addf %245, %247 : vector<16x32xf32>
    %c1_97 = arith.constant 1 : index
    %c2_98 = arith.constant 2 : index
    %c0_99 = arith.constant 0 : index
    %c0_100 = arith.constant 0 : index
    %249 = vector.load %arg4[%c1_97, %c2_98, %c0_99, %c0_100] : memref<2x3x32x32xbf16, #tpu.memory_space<vmem>>, vector<1x1x32x32xbf16>
    %250 = vector.shape_cast %249 : vector<1x1x32x32xbf16> to vector<32x32xbf16>
    %cst_101 = arith.constant dense<0.000000e+00> : vector<16x32xf32>
    %251 = tpu.matmul %234, %250, %cst_101 {dimension_numbers = #tpu.dot_dimension_numbers<[1], [0], [0], [1], [0, 0, 1, 1], [], []>} : vector<16x32xbf16>, vector<32x32xbf16>, vector<16x32xf32> -> vector<16x32xf32>
    %252 = vector.extract_strided_slice %236 {offsets = [2, 0], sizes = [1, 32], strides = [1, 1]} : vector<16x32xf32> to vector<1x32xf32>
    %253 = vector.broadcast %252 : vector<1x32xf32> to vector<16x32xf32>
    %254 = arith.addf %251, %253 : vector<16x32xf32>
    %255 = vector.extract_strided_slice %242 {offsets = [0, 0], sizes = [16, 8], strides = [1, 1]} : vector<16x32xf32> to vector<16x8xf32>
    %256 = arith.truncf %255 : vector<16x8xf32> to vector<16x8xbf16>
    %257 = vector.extract_strided_slice %248 {offsets = [0, 0], sizes = [16, 8], strides = [1, 1]} : vector<16x32xf32> to vector<16x8xf32>
    %258 = arith.truncf %257 : vector<16x8xf32> to vector<16x8xbf16>
    %259 = vector.extract_strided_slice %254 {offsets = [0, 0], sizes = [16, 8], strides = [1, 1]} : vector<16x32xf32> to vector<16x8xf32>
    %260 = arith.truncf %259 : vector<16x8xf32> to vector<16x8xbf16>
    "tpu.trace_start"() <{level = 10 : i32, message = "qd,kd->qk"}> : () -> ()
    %cst_102 = arith.constant dense<0.000000e+00> : vector<16x16xf32>
    %261 = tpu.matmul %256, %258, %cst_102 {dimension_numbers = #tpu.dot_dimension_numbers<[1], [1], [0], [0], [0, 0, 1, 0], [], []>} : vector<16x8xbf16>, vector<16x8xbf16>, vector<16x16xf32> -> vector<16x16xf32>
    "tpu.trace_stop"() : () -> ()
    %cst_103 = arith.constant 0.353553385 : f32
    %262 = vector.broadcast %cst_103 : f32 to vector<16x16xf32>
    %263 = arith.mulf %261, %262 : vector<16x16xf32>
    %264 = arith.addf %263, %11 : vector<16x16xf32>
    %cst_104 = arith.constant dense<0xFF800000> : vector<16xf32>
    %265 = vector.multi_reduction <maximumf>, %264, %cst_104 [1] : vector<16x16xf32> to vector<16xf32>
    %266 = vector.shape_cast %265 : vector<16xf32> to vector<16x1xf32>
    %267 = vector.broadcast %266 : vector<16x1xf32> to vector<16x16xf32>
    %268 = arith.subf %264, %267 : vector<16x16xf32>
    %269 = math.exp %268 : vector<16x16xf32>
    %cst_105 = arith.constant dense<0.000000e+00> : vector<16xf32>
    %270 = vector.multi_reduction <add>, %269, %cst_105 [1] : vector<16x16xf32> to vector<16xf32>
    %271 = vector.shape_cast %270 : vector<16xf32> to vector<16x1xf32>
    %272 = tpu.reciprocal %271 {approx = true} : vector<16x1xf32> -> vector<16x1xf32>
    %273 = vector.broadcast %272 : vector<16x1xf32> to vector<16x16xf32>
    %274 = arith.mulf %269, %273 : vector<16x16xf32>
    %275 = arith.truncf %274 : vector<16x16xf32> to vector<16x16xbf16>
    %cst_106 = arith.constant dense<0.000000e+00> : vector<16x8xf32>
    %276 = tpu.matmul %275, %260, %cst_106 {dimension_numbers = #tpu.dot_dimension_numbers<[1], [0], [0], [1], [0, 0, 1, 1], [], []>} : vector<16x16xbf16>, vector<16x8xbf16>, vector<16x8xf32> -> vector<16x8xf32>
    %277 = vector.extract_strided_slice %242 {offsets = [0, 8], sizes = [16, 8], strides = [1, 1]} : vector<16x32xf32> to vector<16x8xf32>
    %278 = arith.truncf %277 : vector<16x8xf32> to vector<16x8xbf16>
    %279 = vector.extract_strided_slice %248 {offsets = [0, 8], sizes = [16, 8], strides = [1, 1]} : vector<16x32xf32> to vector<16x8xf32>
    %280 = arith.truncf %279 : vector<16x8xf32> to vector<16x8xbf16>
    %281 = vector.extract_strided_slice %254 {offsets = [0, 8], sizes = [16, 8], strides = [1, 1]} : vector<16x32xf32> to vector<16x8xf32>
    %282 = arith.truncf %281 : vector<16x8xf32> to vector<16x8xbf16>
    "tpu.trace_start"() <{level = 10 : i32, message = "qd,kd->qk"}> : () -> ()
    %cst_107 = arith.constant dense<0.000000e+00> : vector<16x16xf32>
    %283 = tpu.matmul %278, %280, %cst_107 {dimension_numbers = #tpu.dot_dimension_numbers<[1], [1], [0], [0], [0, 0, 1, 0], [], []>} : vector<16x8xbf16>, vector<16x8xbf16>, vector<16x16xf32> -> vector<16x16xf32>
    "tpu.trace_stop"() : () -> ()
    %cst_108 = arith.constant 0.353553385 : f32
    %284 = vector.broadcast %cst_108 : f32 to vector<16x16xf32>
    %285 = arith.mulf %283, %284 : vector<16x16xf32>
    %286 = arith.addf %285, %11 : vector<16x16xf32>
    %cst_109 = arith.constant dense<0xFF800000> : vector<16xf32>
    %287 = vector.multi_reduction <maximumf>, %286, %cst_109 [1] : vector<16x16xf32> to vector<16xf32>
    %288 = vector.shape_cast %287 : vector<16xf32> to vector<16x1xf32>
    %289 = vector.broadcast %288 : vector<16x1xf32> to vector<16x16xf32>
    %290 = arith.subf %286, %289 : vector<16x16xf32>
    %291 = math.exp %290 : vector<16x16xf32>
    %cst_110 = arith.constant dense<0.000000e+00> : vector<16xf32>
    %292 = vector.multi_reduction <add>, %291, %cst_110 [1] : vector<16x16xf32> to vector<16xf32>
    %293 = vector.shape_cast %292 : vector<16xf32> to vector<16x1xf32>
    %294 = tpu.reciprocal %293 {approx = true} : vector<16x1xf32> -> vector<16x1xf32>
    %295 = vector.broadcast %294 : vector<16x1xf32> to vector<16x16xf32>
    %296 = arith.mulf %291, %295 : vector<16x16xf32>
    %297 = arith.truncf %296 : vector<16x16xf32> to vector<16x16xbf16>
    %cst_111 = arith.constant dense<0.000000e+00> : vector<16x8xf32>
    %298 = tpu.matmul %297, %282, %cst_111 {dimension_numbers = #tpu.dot_dimension_numbers<[1], [0], [0], [1], [0, 0, 1, 1], [], []>} : vector<16x16xbf16>, vector<16x8xbf16>, vector<16x8xf32> -> vector<16x8xf32>
    %299 = vector.extract_strided_slice %242 {offsets = [0, 16], sizes = [16, 8], strides = [1, 1]} : vector<16x32xf32> to vector<16x8xf32>
    %300 = arith.truncf %299 : vector<16x8xf32> to vector<16x8xbf16>
    %301 = vector.extract_strided_slice %248 {offsets = [0, 16], sizes = [16, 8], strides = [1, 1]} : vector<16x32xf32> to vector<16x8xf32>
    %302 = arith.truncf %301 : vector<16x8xf32> to vector<16x8xbf16>
    %303 = vector.extract_strided_slice %254 {offsets = [0, 16], sizes = [16, 8], strides = [1, 1]} : vector<16x32xf32> to vector<16x8xf32>
    %304 = arith.truncf %303 : vector<16x8xf32> to vector<16x8xbf16>
    "tpu.trace_start"() <{level = 10 : i32, message = "qd,kd->qk"}> : () -> ()
    %cst_112 = arith.constant dense<0.000000e+00> : vector<16x16xf32>
    %305 = tpu.matmul %300, %302, %cst_112 {dimension_numbers = #tpu.dot_dimension_numbers<[1], [1], [0], [0], [0, 0, 1, 0], [], []>} : vector<16x8xbf16>, vector<16x8xbf16>, vector<16x16xf32> -> vector<16x16xf32>
    "tpu.trace_stop"() : () -> ()
    %cst_113 = arith.constant 0.353553385 : f32
    %306 = vector.broadcast %cst_113 : f32 to vector<16x16xf32>
    %307 = arith.mulf %305, %306 : vector<16x16xf32>
    %308 = arith.addf %307, %11 : vector<16x16xf32>
    %cst_114 = arith.constant dense<0xFF800000> : vector<16xf32>
    %309 = vector.multi_reduction <maximumf>, %308, %cst_114 [1] : vector<16x16xf32> to vector<16xf32>
    %310 = vector.shape_cast %309 : vector<16xf32> to vector<16x1xf32>
    %311 = vector.broadcast %310 : vector<16x1xf32> to vector<16x16xf32>
    %312 = arith.subf %308, %311 : vector<16x16xf32>
    %313 = math.exp %312 : vector<16x16xf32>
    %cst_115 = arith.constant dense<0.000000e+00> : vector<16xf32>
    %314 = vector.multi_reduction <add>, %313, %cst_115 [1] : vector<16x16xf32> to vector<16xf32>
    %315 = vector.shape_cast %314 : vector<16xf32> to vector<16x1xf32>
    %316 = tpu.reciprocal %315 {approx = true} : vector<16x1xf32> -> vector<16x1xf32>
    %317 = vector.broadcast %316 : vector<16x1xf32> to vector<16x16xf32>
    %318 = arith.mulf %313, %317 : vector<16x16xf32>
    %319 = arith.truncf %318 : vector<16x16xf32> to vector<16x16xbf16>
    %cst_116 = arith.constant dense<0.000000e+00> : vector<16x8xf32>
    %320 = tpu.matmul %319, %304, %cst_116 {dimension_numbers = #tpu.dot_dimension_numbers<[1], [0], [0], [1], [0, 0, 1, 1], [], []>} : vector<16x16xbf16>, vector<16x8xbf16>, vector<16x8xf32> -> vector<16x8xf32>
    %321 = vector.extract_strided_slice %242 {offsets = [0, 24], sizes = [16, 8], strides = [1, 1]} : vector<16x32xf32> to vector<16x8xf32>
    %322 = arith.truncf %321 : vector<16x8xf32> to vector<16x8xbf16>
    %323 = vector.extract_strided_slice %248 {offsets = [0, 24], sizes = [16, 8], strides = [1, 1]} : vector<16x32xf32> to vector<16x8xf32>
    %324 = arith.truncf %323 : vector<16x8xf32> to vector<16x8xbf16>
    %325 = vector.extract_strided_slice %254 {offsets = [0, 24], sizes = [16, 8], strides = [1, 1]} : vector<16x32xf32> to vector<16x8xf32>
    %326 = arith.truncf %325 : vector<16x8xf32> to vector<16x8xbf16>
    "tpu.trace_start"() <{level = 10 : i32, message = "qd,kd->qk"}> : () -> ()
    %cst_117 = arith.constant dense<0.000000e+00> : vector<16x16xf32>
    %327 = tpu.matmul %322, %324, %cst_117 {dimension_numbers = #tpu.dot_dimension_numbers<[1], [1], [0], [0], [0, 0, 1, 0], [], []>} : vector<16x8xbf16>, vector<16x8xbf16>, vector<16x16xf32> -> vector<16x16xf32>
    "tpu.trace_stop"() : () -> ()
    %cst_118 = arith.constant 0.353553385 : f32
    %328 = vector.broadcast %cst_118 : f32 to vector<16x16xf32>
    %329 = arith.mulf %327, %328 : vector<16x16xf32>
    %330 = arith.addf %329, %11 : vector<16x16xf32>
    %cst_119 = arith.constant dense<0xFF800000> : vector<16xf32>
    %331 = vector.multi_reduction <maximumf>, %330, %cst_119 [1] : vector<16x16xf32> to vector<16xf32>
    %332 = vector.shape_cast %331 : vector<16xf32> to vector<16x1xf32>
    %333 = vector.broadcast %332 : vector<16x1xf32> to vector<16x16xf32>
    %334 = arith.subf %330, %333 : vector<16x16xf32>
    %335 = math.exp %334 : vector<16x16xf32>
    %cst_120 = arith.constant dense<0.000000e+00> : vector<16xf32>
    %336 = vector.multi_reduction <add>, %335, %cst_120 [1] : vector<16x16xf32> to vector<16xf32>
    %337 = vector.shape_cast %336 : vector<16xf32> to vector<16x1xf32>
    %338 = tpu.reciprocal %337 {approx = true} : vector<16x1xf32> -> vector<16x1xf32>
    %339 = vector.broadcast %338 : vector<16x1xf32> to vector<16x16xf32>
    %340 = arith.mulf %335, %339 : vector<16x16xf32>
    %341 = arith.truncf %340 : vector<16x16xf32> to vector<16x16xbf16>
    %cst_121 = arith.constant dense<0.000000e+00> : vector<16x8xf32>
    %342 = tpu.matmul %341, %326, %cst_121 {dimension_numbers = #tpu.dot_dimension_numbers<[1], [0], [0], [1], [0, 0, 1, 1], [], []>} : vector<16x16xbf16>, vector<16x8xbf16>, vector<16x8xf32> -> vector<16x8xf32>
    %343 = tpu.concatenate %276, %298, %320, %342 in 1 : vector<16x8xf32>, vector<16x8xf32>, vector<16x8xf32>, vector<16x8xf32> -> vector<16x32xf32>
    %344 = arith.truncf %343 : vector<16x32xf32> to vector<16x32xbf16>
    %c1_122 = arith.constant 1 : index
    %c0_123 = arith.constant 0 : index
    %c0_124 = arith.constant 0 : index
    %345 = vector.load %arg5[%c1_122, %c0_123, %c0_124] : memref<2x32x32xbf16, #tpu.memory_space<vmem>>, vector<1x32x32xbf16>
    %346 = vector.shape_cast %345 : vector<1x32x32xbf16> to vector<32x32xbf16>
    %cst_125 = arith.constant dense<0.000000e+00> : vector<16x32xf32>
    %347 = tpu.matmul %344, %346, %cst_125 {dimension_numbers = #tpu.dot_dimension_numbers<[1], [0], [0], [1], [0, 0, 1, 1], [], []>} : vector<16x32xbf16>, vector<32x32xbf16>, vector<16x32xf32> -> vector<16x32xf32>
    %348 = vector.extract_strided_slice %236 {offsets = [3, 0], sizes = [1, 32], strides = [1, 1]} : vector<16x32xf32> to vector<1x32xf32>
    %349 = vector.broadcast %348 : vector<1x32xf32> to vector<16x32xf32>
    %350 = arith.addf %347, %349 : vector<16x32xf32>
    %351 = arith.addf %233, %350 : vector<16x32xf32>
    %352 = vector.extract_strided_slice %236 {offsets = [5, 0], sizes = [1, 32], strides = [1, 1]} : vector<16x32xf32> to vector<1x32xf32>
    %353 = vector.extract_strided_slice %236 {offsets = [6, 0], sizes = [1, 32], strides = [1, 1]} : vector<16x32xf32> to vector<1x32xf32>
    %cst_126 = arith.constant dense<0.000000e+00> : vector<16xf32>
    %354 = vector.multi_reduction <add>, %351, %cst_126 [1] : vector<16x32xf32> to vector<16xf32>
    %355 = vector.shape_cast %354 : vector<16xf32> to vector<16x1xf32>
    %cst_127 = arith.constant 3.200000e+01 : f32
    %356 = vector.broadcast %cst_127 : f32 to vector<16x1xf32>
    %357 = arith.divf %355, %356 : vector<16x1xf32>
    %358 = vector.broadcast %357 : vector<16x1xf32> to vector<16x32xf32>
    %359 = arith.subf %351, %358 : vector<16x32xf32>
    %360 = arith.mulf %359, %359 : vector<16x32xf32>
    %cst_128 = arith.constant dense<0.000000e+00> : vector<16xf32>
    %361 = vector.multi_reduction <add>, %360, %cst_128 [1] : vector<16x32xf32> to vector<16xf32>
    %362 = vector.shape_cast %361 : vector<16xf32> to vector<16x1xf32>
    %cst_129 = arith.constant 3.200000e+01 : f32
    %363 = vector.broadcast %cst_129 : f32 to vector<16x1xf32>
    %364 = arith.divf %362, %363 : vector<16x1xf32>
    %365 = vector.broadcast %357 : vector<16x1xf32> to vector<16x32xf32>
    %366 = arith.subf %351, %365 : vector<16x32xf32>
    %cst_130 = arith.constant 9.99999974E-6 : f32
    %367 = vector.broadcast %cst_130 : f32 to vector<16x1xf32>
    %368 = arith.addf %364, %367 : vector<16x1xf32>
    %369 = math.rsqrt %368 : vector<16x1xf32>
    %370 = vector.broadcast %369 : vector<16x1xf32> to vector<16x32xf32>
    %371 = arith.mulf %366, %370 : vector<16x32xf32>
    %372 = vector.broadcast %352 : vector<1x32xf32> to vector<16x32xf32>
    %373 = arith.mulf %371, %372 : vector<16x32xf32>
    %374 = vector.broadcast %353 : vector<1x32xf32> to vector<16x32xf32>
    %375 = arith.addf %373, %374 : vector<16x32xf32>
    %376 = arith.truncf %375 : vector<16x32xf32> to vector<16x32xbf16>
    %c1_131 = arith.constant 1 : index
    %c0_132 = arith.constant 0 : index
    %c0_133 = arith.constant 0 : index
    %377 = vector.load %arg6[%c1_131, %c0_132, %c0_133] : memref<2x32x128xbf16, #tpu.memory_space<vmem>>, vector<1x32x128xbf16>
    %378 = vector.shape_cast %377 : vector<1x32x128xbf16> to vector<32x128xbf16>
    %cst_134 = arith.constant dense<0.000000e+00> : vector<16x128xf32>
    %379 = tpu.matmul %376, %378, %cst_134 {dimension_numbers = #tpu.dot_dimension_numbers<[1], [0], [0], [1], [0, 0, 1, 1], [], []>} : vector<16x32xbf16>, vector<32x128xbf16>, vector<16x128xf32> -> vector<16x128xf32>
    %c1_135 = arith.constant 1 : index
    %c0_136 = arith.constant 0 : index
    %c0_137 = arith.constant 0 : index
    %380 = vector.load %arg9[%c1_135, %c0_136, %c0_137] : memref<2x1x128xf32, #tpu.memory_space<vmem>>, vector<1x1x128xf32>
    %381 = vector.shape_cast %380 : vector<1x1x128xf32> to vector<1x128xf32>
    %382 = vector.broadcast %381 : vector<1x128xf32> to vector<16x128xf32>
    %383 = arith.addf %379, %382 : vector<16x128xf32>
    %cst_138 = arith.constant 5.000000e-01 : f32
    %384 = vector.broadcast %cst_138 : f32 to vector<16x128xf32>
    %385 = arith.mulf %384, %383 : vector<16x128xf32>
    %cst_139 = arith.constant 0.707106769 : f32
    %386 = vector.broadcast %cst_139 : f32 to vector<16x128xf32>
    %387 = arith.mulf %383, %386 : vector<16x128xf32>
    %388 = math.absf %387 : vector<16x128xf32>
    %cst_140 = arith.constant 0.327591091 : f32
    %389 = vector.broadcast %cst_140 : f32 to vector<16x128xf32>
    %390 = arith.mulf %389, %388 : vector<16x128xf32>
    %cst_141 = arith.constant 1.000000e+00 : f32
    %391 = vector.broadcast %cst_141 : f32 to vector<16x128xf32>
    %392 = arith.addf %391, %390 : vector<16x128xf32>
    %cst_142 = arith.constant 1.000000e+00 : f32
    %393 = vector.broadcast %cst_142 : f32 to vector<16x128xf32>
    %394 = arith.divf %393, %392 : vector<16x128xf32>
    %cst_143 = arith.constant 1.06140542 : f32
    %395 = vector.broadcast %cst_143 : f32 to vector<16x128xf32>
    %396 = arith.mulf %395, %394 : vector<16x128xf32>
    %cst_144 = arith.constant -1.45315206 : f32
    %397 = vector.broadcast %cst_144 : f32 to vector<16x128xf32>
    %398 = arith.addf %396, %397 : vector<16x128xf32>
    %399 = arith.mulf %398, %394 : vector<16x128xf32>
    %cst_145 = arith.constant 1.42141378 : f32
    %400 = vector.broadcast %cst_145 : f32 to vector<16x128xf32>
    %401 = arith.addf %399, %400 : vector<16x128xf32>
    %402 = arith.mulf %401, %394 : vector<16x128xf32>
    %cst_146 = arith.constant -0.284496725 : f32
    %403 = vector.broadcast %cst_146 : f32 to vector<16x128xf32>
    %404 = arith.addf %402, %403 : vector<16x128xf32>
    %405 = arith.mulf %404, %394 : vector<16x128xf32>
    %cst_147 = arith.constant 0.254829586 : f32
    %406 = vector.broadcast %cst_147 : f32 to vector<16x128xf32>
    %407 = arith.addf %405, %406 : vector<16x128xf32>
    %408 = arith.mulf %407, %394 : vector<16x128xf32>
    %cst_148 = arith.constant 0.000000e+00 : f32
    %409 = vector.broadcast %cst_148 : f32 to vector<16x128xf32>
    %410 = arith.subf %409, %388 : vector<16x128xf32>
    %411 = arith.mulf %410, %388 : vector<16x128xf32>
    %412 = math.exp %411 : vector<16x128xf32>
    %413 = arith.mulf %408, %412 : vector<16x128xf32>
    %cst_149 = arith.constant 1.000000e+00 : f32
    %414 = vector.broadcast %cst_149 : f32 to vector<16x128xf32>
    %415 = arith.subf %414, %413 : vector<16x128xf32>
    %cst_150 = arith.constant 0.000000e+00 : f32
    %416 = vector.broadcast %cst_150 : f32 to vector<16x128xf32>
    %417 = arith.cmpf oge, %387, %416 : vector<16x128xf32>
    %cst_151 = arith.constant 0.000000e+00 : f32
    %418 = vector.broadcast %cst_151 : f32 to vector<16x128xf32>
    %419 = arith.subf %418, %415 : vector<16x128xf32>
    %420 = arith.select %417, %415, %419 : vector<16x128xi1>, vector<16x128xf32>
    %cst_152 = arith.constant 1.000000e+00 : f32
    %421 = vector.broadcast %cst_152 : f32 to vector<16x128xf32>
    %422 = arith.addf %421, %420 : vector<16x128xf32>
    %423 = arith.mulf %385, %422 : vector<16x128xf32>
    %424 = arith.truncf %423 : vector<16x128xf32> to vector<16x128xbf16>
    %c1_153 = arith.constant 1 : index
    %c0_154 = arith.constant 0 : index
    %c0_155 = arith.constant 0 : index
    %425 = vector.load %arg7[%c1_153, %c0_154, %c0_155] : memref<2x128x32xbf16, #tpu.memory_space<vmem>>, vector<1x128x32xbf16>
    %426 = vector.shape_cast %425 : vector<1x128x32xbf16> to vector<128x32xbf16>
    %cst_156 = arith.constant dense<0.000000e+00> : vector<16x32xf32>
    %427 = tpu.matmul %424, %426, %cst_156 {dimension_numbers = #tpu.dot_dimension_numbers<[1], [0], [0], [1], [0, 0, 1, 1], [], []>} : vector<16x128xbf16>, vector<128x32xbf16>, vector<16x32xf32> -> vector<16x32xf32>
    %428 = vector.extract_strided_slice %236 {offsets = [4, 0], sizes = [1, 32], strides = [1, 1]} : vector<16x32xf32> to vector<1x32xf32>
    %429 = vector.broadcast %428 : vector<1x32xf32> to vector<16x32xf32>
    %430 = arith.addf %427, %429 : vector<16x32xf32>
    %431 = arith.addf %375, %430 : vector<16x32xf32>
    %432 = vector.extract_strided_slice %236 {offsets = [7, 0], sizes = [1, 32], strides = [1, 1]} : vector<16x32xf32> to vector<1x32xf32>
    %433 = vector.extract_strided_slice %236 {offsets = [8, 0], sizes = [1, 32], strides = [1, 1]} : vector<16x32xf32> to vector<1x32xf32>
    %cst_157 = arith.constant dense<0.000000e+00> : vector<16xf32>
    %434 = vector.multi_reduction <add>, %431, %cst_157 [1] : vector<16x32xf32> to vector<16xf32>
    %435 = vector.shape_cast %434 : vector<16xf32> to vector<16x1xf32>
    %cst_158 = arith.constant 3.200000e+01 : f32
    %436 = vector.broadcast %cst_158 : f32 to vector<16x1xf32>
    %437 = arith.divf %435, %436 : vector<16x1xf32>
    %438 = vector.broadcast %437 : vector<16x1xf32> to vector<16x32xf32>
    %439 = arith.subf %431, %438 : vector<16x32xf32>
    %440 = arith.mulf %439, %439 : vector<16x32xf32>
    %cst_159 = arith.constant dense<0.000000e+00> : vector<16xf32>
    %441 = vector.multi_reduction <add>, %440, %cst_159 [1] : vector<16x32xf32> to vector<16xf32>
    %442 = vector.shape_cast %441 : vector<16xf32> to vector<16x1xf32>
    %cst_160 = arith.constant 3.200000e+01 : f32
    %443 = vector.broadcast %cst_160 : f32 to vector<16x1xf32>
    %444 = arith.divf %442, %443 : vector<16x1xf32>
    %445 = vector.broadcast %437 : vector<16x1xf32> to vector<16x32xf32>
    %446 = arith.subf %431, %445 : vector<16x32xf32>
    %cst_161 = arith.constant 9.99999974E-6 : f32
    %447 = vector.broadcast %cst_161 : f32 to vector<16x1xf32>
    %448 = arith.addf %444, %447 : vector<16x1xf32>
    %449 = math.rsqrt %448 : vector<16x1xf32>
    %450 = vector.broadcast %449 : vector<16x1xf32> to vector<16x32xf32>
    %451 = arith.mulf %446, %450 : vector<16x32xf32>
    %452 = vector.broadcast %432 : vector<1x32xf32> to vector<16x32xf32>
    %453 = arith.mulf %451, %452 : vector<16x32xf32>
    %454 = vector.broadcast %433 : vector<1x32xf32> to vector<16x32xf32>
    %455 = arith.addf %453, %454 : vector<16x32xf32>
    %456 = vector.extract_strided_slice %455 {offsets = [8, 0], sizes = [4, 32], strides = [1, 1]} : vector<16x32xf32> to vector<4x32xf32>
    %457 = arith.truncf %456 : vector<4x32xf32> to vector<4x32xbf16>
    %c0_162 = arith.constant 0 : index
    %c0_163 = arith.constant 0 : index
    %458 = vector.load %arg10[%c0_162, %c0_163] : memref<32x64xbf16, #tpu.memory_space<vmem>>, vector<32x64xbf16>
    %cst_164 = arith.constant dense<0.000000e+00> : vector<4x64xf32>
    %459 = tpu.matmul %457, %458, %cst_164 {dimension_numbers = #tpu.dot_dimension_numbers<[1], [0], [0], [1], [0, 0, 1, 1], [], []>} : vector<4x32xbf16>, vector<32x64xbf16>, vector<4x64xf32> -> vector<4x64xf32>
    %c0_165 = arith.constant 0 : index
    %c0_166 = arith.constant 0 : index
    %460 = vector.load %arg11[%c0_165, %c0_166] : memref<1x64xf32, #tpu.memory_space<vmem>>, vector<1x64xf32>
    %461 = vector.broadcast %460 : vector<1x64xf32> to vector<4x64xf32>
    %462 = arith.addf %459, %461 : vector<4x64xf32>
    %c0_167 = arith.constant 0 : index
    %c0_168 = arith.constant 0 : index
    %c0_169 = arith.constant 0 : index
    %463 = vector.load %arg12[%c0_167, %c0_168, %c0_169] : memref<1x4x64xf32, #tpu.memory_space<vmem>>, vector<1x4x64xf32>
    %464 = vector.shape_cast %463 : vector<1x4x64xf32> to vector<4x64xf32>
    %465 = vector.shape_cast %462 : vector<4x64xf32> to vector<1x4x64xf32>
    tpu.vector_store %arg12[%c0_167, %c0_168, %c0_169], %465 {strides = array<i32>} : memref<1x4x64xf32, #tpu.memory_space<vmem>>, vector<1x4x64xf32>,
    return
  }
  func.func @transform_0(%arg0: i32) -> (i32, i32, i32) {
    %c0_i32 = arith.constant 0 : i32
    %c0_i32_0 = arith.constant 0 : i32
    %c0_i32_1 = arith.constant 0 : i32
    return %arg0, %c0_i32, %c0_i32_0 : i32, i32, i32
  }
  func.func @transform_1(%arg0: i32) -> (i32, i32) {
    %c0_i32 = arith.constant 0 : i32
    %c0_i32_0 = arith.constant 0 : i32
    %c0_i32_1 = arith.constant 0 : i32
    return %c0_i32, %c0_i32_0 : i32, i32
  }
  func.func @transform_2(%arg0: i32) -> (i32, i32) {
    %c0_i32 = arith.constant 0 : i32
    %c0_i32_0 = arith.constant 0 : i32
    %c0_i32_1 = arith.constant 0 : i32
    return %c0_i32, %c0_i32_0 : i32, i32
  }
  func.func @transform_3(%arg0: i32) -> (i32, i32, i32, i32) {
    %c0_i32 = arith.constant 0 : i32
    %c0_i32_0 = arith.constant 0 : i32
    %c0_i32_1 = arith.constant 0 : i32
    %c0_i32_2 = arith.constant 0 : i32
    %c0_i32_3 = arith.constant 0 : i32
    return %c0_i32, %c0_i32_0, %c0_i32_1, %c0_i32_2 : i32, i32, i32, i32
  }
  func.func @transform_4(%arg0: i32) -> (i32, i32, i32) {
    %c0_i32 = arith.constant 0 : i32
    %c0_i32_0 = arith.constant 0 : i32
    %c0_i32_1 = arith.constant 0 : i32
    %c0_i32_2 = arith.constant 0 : i32
    return %c0_i32, %c0_i32_0, %c0_i32_1 : i32, i32, i32
  }
  func.func @transform_5(%arg0: i32) -> (i32, i32, i32) {
    %c0_i32 = arith.constant 0 : i32
    %c0_i32_0 = arith.constant 0 : i32
    %c0_i32_1 = arith.constant 0 : i32
    %c0_i32_2 = arith.constant 0 : i32
    return %c0_i32, %c0_i32_0, %c0_i32_1 : i32, i32, i32
  }
  func.func @transform_6(%arg0: i32) -> (i32, i32, i32) {
    %c0_i32 = arith.constant 0 : i32
    %c0_i32_0 = arith.constant 0 : i32
    %c0_i32_1 = arith.constant 0 : i32
    %c0_i32_2 = arith.constant 0 : i32
    return %c0_i32, %c0_i32_0, %c0_i32_1 : i32, i32, i32
  }
  func.func @transform_7(%arg0: i32) -> (i32, i32, i32) {
    %c0_i32 = arith.constant 0 : i32
    %c0_i32_0 = arith.constant 0 : i32
    %c0_i32_1 = arith.constant 0 : i32
    %c0_i32_2 = arith.constant 0 : i32
    return %c0_i32, %c0_i32_0, %c0_i32_1 : i32, i32, i32
  }
  func.func @transform_8(%arg0: i32) -> (i32, i32, i32) {
    %c0_i32 = arith.constant 0 : i32
    %c0_i32_0 = arith.constant 0 : i32
    %c0_i32_1 = arith.constant 0 : i32
    %c0_i32_2 = arith.constant 0 : i32
    return %c0_i32, %c0_i32_0, %c0_i32_1 : i32, i32, i32
  }
  func.func @transform_9(%arg0: i32) -> (i32, i32) {
    %c0_i32 = arith.constant 0 : i32
    %c0_i32_0 = arith.constant 0 : i32
    %c0_i32_1 = arith.constant 0 : i32
    return %c0_i32, %c0_i32_0 : i32, i32
  }
  func.func @transform_10(%arg0: i32) -> (i32, i32) {
    %c0_i32 = arith.constant 0 : i32
    %c0_i32_0 = arith.constant 0 : i32
    %c0_i32_1 = arith.constant 0 : i32
    return %c0_i32, %c0_i32_0 : i32, i32
  }
  func.func @transform_11(%arg0: i32) -> (i32, i32, i32) {
    %c0_i32 = arith.constant 0 : i32
    %c0_i32_0 = arith.constant 0 : i32
    %c0_i32_1 = arith.constant 0 : i32
    return %arg0, %c0_i32, %c0_i32_0 : i32, i32, i32
  }
}

</mosaic_0001>

<bundles_post_ra>
// kernel: spatiotemporal_vit_forward.1
= control target key start
LH: loop header
LB: loop body
LE: loop exit
PB: predicated region body
PF: predicated region fallthrough
CT: control target
= control target key end

     0   :  { %s3503_s17 = smov 0   ;;  %s4036_s0 = inlined_call_operand.vmem [shape: bf16[2,16,64], index: 0, kind: input, shape index: {}]   ;;  %s4037_s1 = inlined_call_operand.vmem [shape: bf16[64,32], index: 1, kind: input, shape index: {}]   ;;  %s4038_s2 = inlined_call_operand.vmem [shape: f32[16,32], index: 2, kind: input, shape index: {}]   ;;  %s4039_s3 = inlined_call_operand.vmem [shape: bf16[2,3,32,32], index: 3, kind: input, shape index: {}]   ;;  %s4040_s4 = inlined_call_operand.vmem [shape: bf16[2,32,32], index: 4, kind: input, shape index: {}]   ;;  %s4041_s5 = inlined_call_operand.vmem [shape: bf16[2,32,128], index: 5, kind: input, shape index: {}]   ;;  %s4042_s6 = inlined_call_operand.vmem [shape: bf16[2,128,32], index: 6, kind: input, shape index: {}]   ;;  %s4043_s7 = inlined_call_operand.vmem [shape: f32[2,16,32], index: 7, kind: input, shape index: {}]   ;;  %s4044_s8 = inlined_call_operand.vmem [shape: f32[2,1,128], index: 8, kind: input, shape index: {}]   ;;  %s4045_s9 = inlined_call_operand.vmem [shape: bf16[32,64], index: 9, kind: input, shape index: {}]   ;;  %s4046_s10 = inlined_call_operand.vmem [shape: f32[1,64], index: 10, kind: input, shape index: {}]   ;;  %s4047_s11 = inlined_call_operand.vmem [shape: f32[2,4,64], index: 11, kind: output, shape index: {}]  }
   0x1 LB: > { %s2786_s18 = sadd.s32 4294967295, %s3432_s17   ;;  %p2790_p0 = scmp.ge.s32.totalorder %s3432_s17, 1  ;;  %s3432_s17 = sphi %s3503_s17, %s21_s17  }
   0x2   : > { %p337_p1 = scmp.lt.s32.totalorder %s3432_s17, 3 }
   0x4   : > { %p338_p2 = pnand %p2790_p0, %p337_p1 }
   0x5   : > { %p376_p3 = scmp.lt.s32.totalorder (!%p338_p2), %s2786_s18, 1  ;;  %s3436_s13 = smov (!%p338_p2), 112  }
   0x6   : > { %341 = sbr.rel (%p338_p2) target bundleno = 5340 (0x14dc), region = 64  ;;  %s3437_s14 = smov (!%p338_p2), 120  }
   0x7   : > { %s3438_s15 = smov (!%p338_p2), 104   ;;  %s3440_s20 = smov (!%p338_p2), 8  }
   0x8   : > { %s3441_s23 = smov (!%p338_p2), 16   ;;  %s3442_s24 = smov (!%p338_p2), 24  }
   0xb   : > { %v3289_v0 = vld [vmem:[%s4037_s1 + $0x18] sm:$0xff]   ;;  %v3434_v1 = vmov 0.0   ;;  %v3290_v2 = vld [vmem:[%s4037_s1 + $0x10] sm:$0xff]   ;;  %vm3435_vm0 = vmmov 0   ;;  %s4049_s18 = smov (!%p376_p3, %s2786_s18), 1  ;;  %v3291_v3 = vld [vmem:[%s4037_s1 + $0x8] sm:$0xff]   ;;  %v472_v21 = vlaneseq }
   0xc   : > { %3006 = vmatprep.subr.bf16.mxu1 %v3434_v1  ;;  %3034 = vmatprep.subr.bf16.mxu0 %v3434_v1  ;;  %s2917_s25 = sshll.u32 %s4049_s18, 3  ;;  %v3292_v4 = vld [vmem:[%s4037_s1] sm:$0xff]   ;;  %vm427_vm1 = vcmask 523264   ;;  %v3294_v6 = vld [vmem:[%s4039_s3 + $0x8] sm:$0xff]   ;;  %vm499_vm2 = vcmask 261120   ;;  %v3298_v18 = vld [vmem:[%s4039_s3 + $0x18] sm:$0xff]  }
   0xd   : > { %3007 = vmatpush3.bf16.msra.mxu1 %v3289_v0  ;;  %3014 = vmatprep.mubr.msk.bf16.mxu1 %vm3435_vm0, %v3434_v1  ;;  %s380_s28 = scalar_lea.vmem %s4036_s0, %s2917_s25  ;;  %v3295_v7 = vld [vmem:[%s4039_s3 + $0x28] sm:$0xff]   ;;  %v3296_v8 = vld [vmem:[%s4039_s3] sm:$0xff]   ;;  %v3299_v20 = vld [vmem:[%s4039_s3 + $0x10] sm:$0xff]   ;;  %v3587_v22 = vshrl.u32 %v472_v21, 7  ;;  %vm671_vm3 = vcmask 64512   ;;  %v473_v61 = vand.u32 127, %v472_v21 }
   0xe   : > { %3008 = vmatprep.subr.bf16.mxu1 %v3434_v1  ;;  %3038 = vmatprep.mubr.msk.bf16.mxu0 %vm3435_vm0, %v3434_v1  ;;  %v3293_v5 = vld [vmem:[%s380_s28] sm:$0xff]   ;;  %v397_v13 = vld [vmem:[%s4038_s2 + $0x8] sm:$0xff]  ;;  %v3439_v62 = vmov -1e+09   ;;  %vm723_vm5 = vcmask 130048   ;;  %vm1197_vm6 = vcmask 195584  }
   0xf   : > { %3035 = vmatpush3.bf16.msra.mxu0 %v3295_v7  ;;  %v3297_v9 = vld [vmem:[%s4039_s3 + $0x20] sm:$0xff]   ;;  %v613_v23 = vsub.s32 2, %v3587_v22  ;;  %v551_v34 = vsub.s32 1, %v3587_v22  ;;  %v3602_v39 = vsub.s32 0, %v3587_v22  ;;  %vm474_vm4 = vcmp.lt.s32.totalorder %v473_v61, 12  ;;  %s2793_s28 = sshll.u32 %s4049_s18, 2 }
  0x10   : > { %3036 = vmatprep.subr.bf16.mxu0 %v3434_v1  ;;  %v396_v11 = vld [vmem:[%s4038_s2] sm:$0xff]  ;;  %v3638_v63 = vsel %vm474_vm4, 0.0, %v3439_v62  ;;  %s384_s30 = scalar_lea.vmem %s4047_s11, %s2793_s28  ;;  %vm2731_vm11 = vcmask 519168  }
  0x11   : > { %3009 = vmatpush3.bf16.msra.mxu1 %v3290_v2  ;;  %v3593_v24 = vld [vmem:[%s4043_s7] sm:$0xff] }
  0x12   : > { %3010 = vmatprep.subr.bf16.mxu1 %v3434_v1  ;;  %v614_v27 = vrot.slane %v3593_v24, %v613_v23  ;;  %v552_v40 = vrot.slane %v3593_v24, %v551_v34  ;;  %v486_v43 = vrot.slane %v3593_v24, %v3602_v39 }
  0x13   : > { %3037 = vmatpush3.bf16.msra.mxu0 %v3297_v9 }
  0x14   : > { %3048 = vmatprep.subr.bf16.mxu0 %v3434_v1 }
  0x15   : > { %3011 = vmatpush3.bf16.msra.mxu1 %v3291_v3 }
  0x16   : > { %3012 = vmatprep.subr.bf16.mxu1 %v3434_v1 }
  0x19   : > { %3013 = vmatpush3.bf16.msra.mxu1 %v3292_v4 }
  0x1a   : > { %3018 = vmatprep.subr.bf16.mxu1 %v3434_v1 }
  0x1c   : > { %3015 = vmatmul.mubr.msk.bf16.vlgmr.msra.gmra.mxu1 %vm427_vm1, %v3293_v5 }
  0x1d   : > { %3022 = vmatprep.mubr.msk.bf16.mxu1 %vm3435_vm0, %v3434_v1  ;;  %3019 = vmatpush3.bf16.msra.mxu1 %v3294_v6 }
  0x1e   : > { %3020 = vmatprep.subr.bf16.mxu1 %v3434_v1 }
  0x21   : > { %3021 = vmatpush3.bf16.msra.mxu1 %v3296_v8 }
  0x22   : > { %3026 = vmatprep.subr.bf16.mxu1 %v3434_v1 }
  0xdc   : > { %v465_v10 = vpop.f32.mrf.mxu1 }
  0xdd   : > { %v3563_v15 = vadd.f32 %v465_v10, %v396_v11 }
  0xde   : > { %v3016_v12 = vpop.f32.mrf.mxu1 }
  0xe0   : > { %v468_v14 = vpop.f32.mrf.mxu1 }
  0xe1   : > { %v3565_v16 = vadd.f32 %v468_v14, %v397_v13 }
  0xe2   : > { %v3017_v17 = vpop.f32.mrf.mxu1 }
  0xe3   : > { %v476_v19 = vpack.c.bf16 %v3565_v16, %v3563_v15 }
  0xe5   : > { %3023 = vmatmul.mubr.msk.bf16.vlgmr.msra.gmra.mxu1 %vm499_vm2, %v476_v19  ;;  %3039 = vmatmul.mubr.msk.bf16.vlgmr.msra.gmra.mxu0 %vm499_vm2, %v476_v19 }
  0xe6   : > { %3027 = vmatpush3.bf16.msra.mxu1 %v3298_v18  ;;  %3030 = vmatprep.mubr.msk.bf16.mxu1 %vm3435_vm0, %v3434_v1 }
  0xe7   : > { %3028 = vmatprep.subr.bf16.mxu1 %v3434_v1  ;;  %3050 = vmatprep.mubr.msk.bf16.mxu0 %vm3435_vm0, %v3434_v1 }
  0xea   : > { %3029 = vmatpush3.bf16.msra.mxu1 %v3299_v20 }
  0xeb   : > { %3042 = vmatprep.subr.bf16.mxu1 %v3434_v1 }
  0xed   : > { %3031 = vmatmul.mubr.msk.bf16.vlgmr.msra.gmra.mxu1 %vm499_vm2, %v476_v19 }
  0xee   : > { %3044 = vmatprep.mubr.msk.bf16.mxu1 %vm3435_vm0, %v3434_v1 }
 0x1a5   : > { %v537_v25 = vpop.f32.mrf.mxu1  ;;  %v661_v26 = vpop.f32.mrf.mxu0 }
 0x1a6   : > { %v662_v32 = vadd.f32 %v661_v26, %v614_v27  ;;  %v538_v49 = vadd.f32 %v537_v25, %v486_v43 }
 0x1a7   : > { %v3024_v28 = vpop.f32.mrf.mxu1  ;;  %v3040_v29 = vpop.f32.mrf.mxu0 }
 0x1a9   : > { %v540_v30 = vpop.f32.mrf.mxu1  ;;  %v664_v31 = vpop.f32.mrf.mxu0 }
 0x1aa   : > { %v665_v33 = vadd.f32 %v664_v31, %v614_v27  ;;  %v541_v47 = vadd.f32 %v540_v30, %v486_v43 }
 0x1ab   : > { %v3025_v35 = vpop.f32.mrf.mxu1  ;;  %v3041_v36 = vpop.f32.mrf.mxu0 }
 0x1ac   : > { %v3599_v37 = vpack.c.bf16 %v665_v33, %v662_v32  ;;  %v668_v51 = vpack.c.bf16 %v541_v47, %v538_v49 }
 0x1ad   : > { %v599_v38 = vpop.f32.mrf.mxu1 }
 0x1ae   : > { %3049 = vmatpush3.bf16.msra.mxu0 %v3599_v37  ;;  %v600_v44 = vadd.f32 %v599_v38, %v552_v40 }
 0x1af   : > { %v3032_v41 = vpop.f32.mrf.mxu1  ;;  %3060 = vmatprep.subr.bf16.mxu0 %v3434_v1 }
 0x1b1   : > { %v602_v42 = vpop.f32.mrf.mxu1 }
 0x1b2   : > { %v603_v45 = vadd.f32 %v602_v42, %v552_v40 }
 0x1b3   : > { %v3033_v46 = vpop.f32.mrf.mxu1 }
 0x1b4   : > { %v669_v48 = vpack.c.bf16 %v603_v45, %v600_v44 }
 0x1b6   : > { %921 = vrot.lane.b32.xlu1 %v669_v48, %s3436_s13  ;;  %795 = vrot.lane.b32.xlu0 %v669_v48, %s3437_s14  ;;  %v676_v50 = vsel %vm671_vm3, %v669_v48, 0 }
 0x1b7   : > { %3043 = vmatpush3.bf16.xpose.msra.mxu1 %v676_v50 }
 0x1b8   : > { %3054 = vmatprep.subr.bf16.mxu1 %v3434_v1 }
 0x1ba   : > { %919 = vrot.lane.b32.xlu1 %v668_v51, %s3436_s13  ;;  %792 = vrot.lane.b32.xlu0 %v668_v51, %s3437_s14 }
 0x1be   : > { %1044 = vrot.lane.b32.xlu1 %v668_v51, %s3438_s15  ;;  %1046 = vrot.lane.b32.xlu0 %v669_v48, %s3438_s15 }
 0x1bf   : > { %3045 = vmatmul.mubr.msk.bf16.vlgmr.msra.gmra.mxu1 %vm671_vm3, %v668_v51 }
 0x1c0   : > { %3056 = vmatprep.mubr.msk.bf16.mxu1 %vm3435_vm0, %v3434_v1 }
 0x228   : > { %v796_v52 = vpop.permute.xlu0 %795  ;;  %v922_v54 = vpop.permute.xlu1 %921 }
 0x229   : > { %v801_v53 = vsel %vm671_vm3, %v796_v52, 0  ;;  %v927_v56 = vsel %vm671_vm3, %v922_v54, 0 }
 0x22a   : > { %3055 = vmatpush3.bf16.xpose.msra.mxu1 %v801_v53 }
 0x22b   : > { %3066 = vmatprep.subr.bf16.mxu1 %v3434_v1 }
 0x22c   : > { %v793_v55 = vpop.permute.xlu0 %792  ;;  %v920_v58 = vpop.permute.xlu1 %919 }
 0x230   : > { %v1047_v57 = vpop.permute.xlu0 %1046  ;;  %v1045_v60 = vpop.permute.xlu1 %1044 }
 0x231   : > { %3057 = vmatmul.mubr.msk.bf16.vlgmr.msra.gmra.mxu1 %vm671_vm3, %v793_v55  ;;  %v1052_v59 = vsel %vm671_vm3, %v1047_v57, 0 }
 0x232   : > { %3067 = vmatpush3.bf16.xpose.msra.mxu1 %v927_v56  ;;  %3068 = vmatprep.mubr.msk.bf16.mxu1 %vm3435_vm0, %v3434_v1 }
 0x233   : > { %3078 = vmatprep.subr.bf16.mxu1 %v3434_v1 }
 0x239   : > { %3069 = vmatmul.mubr.msk.bf16.vlgmr.msra.gmra.mxu1 %vm671_vm3, %v920_v58 }
 0x23a   : > { %3079 = vmatpush3.bf16.xpose.msra.mxu1 %v1052_v59  ;;  %3080 = vmatprep.mubr.msk.bf16.mxu1 %vm3435_vm0, %v3434_v1 }
 0x23b   : > { %3090 = vmatprep.subr.bf16.mxu1 %v3434_v1 }
 0x241   : > { %3081 = vmatmul.mubr.msk.bf16.vlgmr.msra.gmra.mxu1 %vm671_vm3, %v1045_v60 }
 0x242   : > { %3094 = vmatprep.mubr.msk.bf16.mxu1 %vm3435_vm0, %v3434_v1 }
 0x27f   : > { %v712_v0 = vpop.f32.mrf.mxu1 }
 0x280   : > { %v719_v2 = vmul.f32 0.35355338, %v712_v0 }
 0x281   : > { %v3046_v3 = vpop.f32.mrf.mxu1 }
 0x282   : > { %v721_v4 = vadd.f32 %v719_v2, %v3638_v63 }
 0x283   : > { %v715_v5 = vpop.f32.mrf.mxu1 }
 0x284   : > { %v720_v6 = vmul.f32 0.35355338, %v715_v5  ;;  %v724_v7 = vsel %vm723_vm5, %v721_v4, -inf }
 0x285   : > { %725 = vmax.xlane.f32.xlu0 %v724_v7  ;;  %v3047_v8 = vpop.f32.mrf.mxu1 }
 0x286   : > { %v722_v9 = vadd.f32 %v720_v6, %v3638_v63 }
 0x288   : > { %v727_v10 = vsel %vm723_vm5, %v722_v9, -inf }
 0x289   : > { %728 = vmax.xlane.f32.xlu1 %v727_v10 }
 0x2f1   : > { %v837_v11 = vpop.f32.mrf.mxu1 }
 0x2f2   : > { %v844_v12 = vmul.f32 0.35355338, %v837_v11 }
 0x2f3   : > { %v3058_v13 = vpop.f32.mrf.mxu1 }
 0x2f4   : > { %v846_v14 = vadd.f32 %v844_v12, %v3638_v63 }
 0x2f5   : > { %v840_v17 = vpop.f32.mrf.mxu1 }
 0x2f6   : > { %v845_v18 = vmul.f32 0.35355338, %v840_v17  ;;  %v848_v19 = vsel %vm723_vm5, %v846_v14, -inf }
 0x2f7   : > { %849 = vmax.xlane.f32.xlu0 %v848_v19  ;;  %v3059_v20 = vpop.f32.mrf.mxu1 }
 0x2f8   : > { %v847_v21 = vadd.f32 %v845_v18, %v3638_v63 }
 0x2f9   : > { %v963_v25 = vpop.f32.mrf.mxu1 }
 0x2fa   : > { %v970_v26 = vmul.f32 0.35355338, %v963_v25  ;;  %v851_v27 = vsel %vm723_vm5, %v847_v21, -inf }
 0x2fb   : > { %852 = vmax.xlane.f32.xlu0 %v851_v27  ;;  %v3070_v28 = vpop.f32.mrf.mxu1 }
 0x2fc   : > { %v972_v29 = vadd.f32 %v970_v26, %v3638_v63 }
 0x2fd   : > { %v966_v30 = vpop.f32.mrf.mxu1 }
 0x2fe   : > { %v971_v31 = vmul.f32 0.35355338, %v966_v30  ;;  %v974_v32 = vsel %vm723_vm5, %v972_v29, -inf }
 0x2ff   : > { %975 = vmax.xlane.f32.xlu1 %v974_v32  ;;  %v3071_v33 = vpop.f32.mrf.mxu1 }
 0x300   : > { %v973_v35 = vadd.f32 %v971_v31, %v3638_v63 }
 0x301   : > { %v1088_v36 = vpop.f32.mrf.mxu1 }
 0x302   : > { %v1095_v38 = vmul.f32 0.35355338, %v1088_v36  ;;  %v977_v40 = vsel %vm723_vm5, %v973_v35, -inf }
 0x303   : > { %978 = vmax.xlane.f32.xlu0 %v977_v40  ;;  %v3082_v41 = vpop.f32.mrf.mxu1 }
 0x304   : > { %v1097_v42 = vadd.f32 %v1095_v38, %v3638_v63 }
 0x305   : > { %v1091_v43 = vpop.f32.mrf.mxu1 }
 0x306   : > { %v1096_v44 = vmul.f32 0.35355338, %v1091_v43  ;;  %v1099_v45 = vsel %vm723_vm5, %v1097_v42, -inf }
 0x307   : > { %1100 = vmax.xlane.f32.xlu1 %v1099_v45  ;;  %v3083_v46 = vpop.f32.mrf.mxu1 }
 0x308   : > { %v1098_v47 = vadd.f32 %v1096_v44, %v3638_v63 }
 0x30a   : > { %v1102_v48 = vsel %vm723_vm5, %v1098_v47, -inf }
 0x30b   : > { %1103 = vmax.xlane.f32.xlu0 %v1102_v48 }
 0x30e   : > { %v726_v49 = vpop.xlane.xlu0 %725 }
 0x30f   : > { %v730_v50 = vsub.f32 %v721_v4, %v726_v49 }
 0x311   : > { %v732_v51 = vmul.f32 1.442695, %v730_v50 }
 0x312   : > { %v729_v52 = vpop.xlane.xlu1 %728 }
 0x313   : > { %3332 = vpow2.f32 %v732_v51  ;;  %v731_v53 = vsub.f32 %v722_v9, %v729_v52 }
 0x315   : > { %v734_v54 = vmul.f32 1.442695, %v731_v53 }
 0x317   : > { %3334 = vpow2.f32 %v734_v54 }
 0x320   : > { %v3333_v55 = vpop.eup %3332 }
 0x321   : > { %v736_v56 = vsel %vm723_vm5, %v3333_v55, 0.0 }
 0x322   : > { %737 = vadd.xlane.f32.xlu1 %v736_v56 }
 0x324   : > { %v3335_v57 = vpop.eup %3334 }
 0x325   : > { %v739_v58 = vsel %vm723_vm5, %v3335_v57, 0.0 }
 0x326   : > { %740 = vadd.xlane.f32.xlu0 %v739_v58 }
 0x333   : > { %872 = vrot.lane.b32.xlu1 %v3599_v37, %s3437_s14 }
 0x380   : > { %v850_v59 = vpop.xlane.xlu0 %849 }
 0x381   : > { %v854_v60 = vsub.f32 %v846_v14, %v850_v59 }
 0x383   : > { %v856_v61 = vmul.f32 1.442695, %v854_v60 }
 0x384   : > { %v853_v62 = vpop.xlane.xlu0 %852 }
 0x385   : > { %3336 = vpow2.f32 %v856_v61  ;;  %v855_v0 = vsub.f32 %v847_v21, %v853_v62 }
 0x387   : > { %v858_v2 = vmul.f32 1.442695, %v855_v0 }
 0x388   : > { %v976_v3 = vpop.xlane.xlu1 %975 }
 0x389   : > { %3338 = vpow2.f32 %v858_v2  ;;  %v980_v4 = vsub.f32 %v972_v29, %v976_v3 }
 0x38b   : > { %v982_v5 = vmul.f32 1.442695, %v980_v4 }
 0x38c   : > { %v979_v6 = vpop.xlane.xlu0 %978 }
 0x38d   : > { %3340 = vpow2.f32 %v982_v5  ;;  %v981_v7 = vsub.f32 %v973_v35, %v979_v6 }
 0x38f   : > { %v984_v8 = vmul.f32 1.442695, %v981_v7 }
 0x390   : > { %v1101_v9 = vpop.xlane.xlu1 %1100 }
 0x391   : > { %3342 = vpow2.f32 %v984_v8  ;;  %v1105_v10 = vsub.f32 %v1097_v42, %v1101_v9 }
 0x392   : > { %v3337_v11 = vpop.eup %3336 }
 0x393   : > { %v1107_v12 = vmul.f32 1.442695, %v1105_v10  ;;  %v860_v13 = vsel %vm723_vm5, %v3337_v11, 0.0  ;;  %v3300_v10 = vld [vmem:[%s4040_s4 + $0x8] sm:$0xff]  }
 0x394   : > { %861 = vadd.xlane.f32.xlu1 %v860_v13  ;;  %v1104_v14 = vpop.xlane.xlu0 %1103  ;;  %3091 = vmatpush3.bf16.msra.mxu1 %v3300_v10 }
 0x395   : > { %3344 = vpow2.f32 %v1107_v12  ;;  %v1106_v17 = vsub.f32 %v1098_v47, %v1104_v14  ;;  %3092 = vmatprep.subr.bf16.mxu1 %v3434_v1 }
 0x396   : > { %v3339_v18 = vpop.eup %3338 }
 0x397   : > { %v1109_v19 = vmul.f32 1.442695, %v1106_v17  ;;  %v863_v20 = vsel %vm723_vm5, %v3339_v18, 0.0 }
 0x398   : > { %864 = vadd.xlane.f32.xlu0 %v863_v20 }
 0x399   : > { %3346 = vpow2.f32 %v1109_v19 }
 0x39a   : > { %v3341_v21 = vpop.eup %3340 }
 0x39b   : > { %v986_v25 = vsel %vm723_vm5, %v3341_v21, 0.0 }
 0x39c   : > { %987 = vadd.xlane.f32.xlu1 %v986_v25 }
 0x39e   : > { %v3343_v26 = vpop.eup %3342 }
 0x39f   : > { %v989_v27 = vsel %vm723_vm5, %v3343_v26, 0.0 }
 0x3a0   : > { %990 = vadd.xlane.f32.xlu0 %v989_v27 }
 0x3a2   : > { %v3345_v28 = vpop.eup %3344 }
 0x3a3   : > { %v1111_v29 = vsel %vm723_vm5, %v3345_v28, 0.0 }
 0x3a4   : > { %1112 = vadd.xlane.f32.xlu1 %v1111_v29 }
 0x3a6   : > { %v3347_v30 = vpop.eup %3346 }
 0x3a7   : > { %v1114_v31 = vsel %vm723_vm5, %v3347_v30, 0.0 }
 0x3a8   : > { %1115 = vadd.xlane.f32.xlu0 %v1114_v31 }
 0x3ab   : > { %v738_v32 = vpop.xlane.xlu1 %737 }
 0x3ac   : > { %3348 = vrcp.f32 %v738_v32 }
 0x3af   : > { %v741_v33 = vpop.xlane.xlu0 %740  ;;  %v873_v42 = vpop.permute.xlu1 %872 }
 0x3b0   : > { %3350 = vrcp.f32 %v741_v33 }
 0x3b5   : > { %1122 = vrot.lane.b32.xlu1 %v3599_v37, %s3438_s15 }
 0x3b9   : > { %v3349_v35 = vpop.eup %3348 }
 0x3ba   : > { %v744_v38 = vmul.f32 %v3349_v35, %v3333_v55 }
 0x3bd   : > { %v3351_v36 = vpop.eup %3350 }
 0x3be   : > { %997 = vrot.lane.b32.xlu0 %v3599_v37, %s3436_s13  ;;  %v745_v40 = vmul.f32 %v3351_v36, %v3335_v57 }
 0x3c0   : > { %v746_v41 = vpack.c.bf16 %v745_v40, %v744_v38 }
 0x3c2   : > { %3051 = vmatmul.mubr.msk.bf16.vlgmr.msra.gmra.mxu0 %vm723_vm5, %v746_v41 }
 0x3c3   : > { %3061 = vmatpush3.bf16.msra.mxu0 %v873_v42  ;;  %3062 = vmatprep.mubr.msk.bf16.mxu0 %vm3435_vm0, %v3434_v1 }
 0x3c4   : > { %3072 = vmatprep.subr.bf16.mxu0 %v3434_v1 }
 0x41d   : > { %v862_v43 = vpop.xlane.xlu1 %861 }
 0x41e   : > { %3352 = vrcp.f32 %v862_v43 }
 0x421   : > { %v865_v44 = vpop.xlane.xlu0 %864 }
 0x422   : > { %3354 = vrcp.f32 %v865_v44 }
 0x425   : > { %v988_v45 = vpop.xlane.xlu1 %987 }
 0x426   : > { %3356 = vrcp.f32 %v988_v45 }
 0x429   : > { %v991_v46 = vpop.xlane.xlu0 %990 }
 0x42a   : > { %3358 = vrcp.f32 %v991_v46 }
 0x42b   : > { %v3353_v37 = vpop.eup %3352 }
 0x42c   : > { %v868_v49 = vmul.f32 %v3353_v37, %v3337_v11 }
 0x42d   : > { %v1113_v47 = vpop.xlane.xlu1 %1112 }
 0x42e   : > { %3360 = vrcp.f32 %v1113_v47  ;;  %v1207_v47 = vsub.s32 3, %v3587_v22 }
 0x42f   : > { %v3355_v48 = vpop.eup %3354 }
 0x430   : > { %v869_v50 = vmul.f32 %v3355_v48, %v3339_v18  ;;  %v3301_v18 = vld [vmem:[%s4040_s4] sm:$0xff]   ;;  %v1208_v48 = vrot.slane %v3593_v24, %v1207_v47 }
 0x431   : > { %v1116_v51 = vpop.xlane.xlu0 %1115  ;;  %v1123_v59 = vpop.permute.xlu1 %1122  ;;  %3093 = vmatpush3.bf16.msra.mxu1 %v3301_v18 }
 0x432   : > { %3362 = vrcp.f32 %v1116_v51  ;;  %v870_v52 = vpack.c.bf16 %v869_v50, %v868_v49  ;;  %3106 = vmatprep.subr.bf16.mxu1 %v3434_v1 }
 0x433   : > { %v3357_v53 = vpop.eup %3356 }
 0x434   : > { %3063 = vmatmul.mubr.msk.bf16.vlgmr.msra.gmra.mxu0 %vm723_vm5, %v870_v52  ;;  %v994_v56 = vmul.f32 %v3357_v53, %v3341_v21 }
 0x435   : > { %v998_v54 = vpop.permute.xlu0 %997  ;;  %3074 = vmatprep.mubr.msk.bf16.mxu0 %vm3435_vm0, %v3434_v1 }
 0x436   : > { %3073 = vmatpush3.bf16.msra.mxu0 %v998_v54 }
 0x437   : > { %v3359_v55 = vpop.eup %3358  ;;  %3084 = vmatprep.subr.bf16.mxu0 %v3434_v1 }
 0x438   : > { %v995_v57 = vmul.f32 %v3359_v55, %v3343_v26 }
 0x43a   : > { %v996_v58 = vpack.c.bf16 %v995_v57, %v994_v56 }
 0x43b   : > { %v3361_v60 = vpop.eup %3360 }
 0x43c   : > { %3075 = vmatmul.mubr.msk.bf16.vlgmr.msra.gmra.mxu0 %vm723_vm5, %v996_v58  ;;  %v1119_v62 = vmul.f32 %v3361_v60, %v3345_v28 }
 0x43d   : > { %3085 = vmatpush3.bf16.msra.mxu0 %v1123_v59  ;;  %3086 = vmatprep.mubr.msk.bf16.mxu0 %vm3435_vm0, %v3434_v1 }
 0x43e   : > { %3098 = vmatprep.subr.bf16.mxu0 %v3434_v1 }
 0x43f   : > { %v3363_v61 = vpop.eup %3362 }
 0x440   : > { %v1120_v0 = vmul.f32 %v3363_v61, %v3347_v30 }
 0x442   : > { %v1121_v2 = vpack.c.bf16 %v1120_v0, %v1119_v62 }
 0x444   : > { %3087 = vmatmul.mubr.msk.bf16.vlgmr.msra.gmra.mxu0 %vm723_vm5, %v1121_v2 }
 0x445   : > { %3102 = vmatprep.mubr.msk.bf16.mxu0 %vm3435_vm0, %v3434_v1 }
 0x482   : > { %v784_v3 = vpop.f32.mrf.mxu0 }
 0x484   : > { %v3052_v4 = vpop.f32.mrf.mxu0 }
 0x486   : > { %v787_v5 = vpop.f32.mrf.mxu0 }
 0x488   : > { %v3053_v6 = vpop.f32.mrf.mxu0 }
 0x489   : > { %v3303_v6 = vld [vmem:[%s4041_s5] sm:$0xff]  }
 0x4f4   : > { %v912_v7 = vpop.f32.mrf.mxu0 }
 0x4f6   : > { %v3064_v8 = vpop.f32.mrf.mxu0 }
 0x4f8   : > { %v915_v9 = vpop.f32.mrf.mxu0 }
 0x4f9   : > { %v3259_v11 = vpack.i.bf16 %v915_v9, %v912_v7 }
 0x4fa   : > { %v3065_v12 = vpop.f32.mrf.mxu0 }
 0x4fb   : > { %3260 = vrot.lane.b32.xlu1 %v3259_v11, %s3440_s20 }
 0x4fc   : > { %v1037_v13 = vpop.f32.mrf.mxu0 }
 0x4fe   : > { %v3076_v14 = vpop.f32.mrf.mxu0 }
 0x500   : > { %v1040_v17 = vpop.f32.mrf.mxu0 }
 0x501   : > { %v3264_v19 = vpack.i.bf16 %v1040_v17, %v1037_v13  ;;  %v1296_v13 = vsub.s32 5, %v3587_v22 }
 0x502   : > { %v3077_v20 = vpop.f32.mrf.mxu0 }
 0x503   : > { %3265 = vrot.lane.b32.xlu0 %v3264_v19, %s3441_s23  ;;  %v1297_v18 = vrot.slane %v3593_v24, %v1296_v13  ;;  %v1302_v19 = vsub.s32 6, %v3587_v22 }
 0x504   : > { %v1162_v21 = vpop.f32.mrf.mxu0 }
 0x506   : > { %v3088_v25 = vpop.f32.mrf.mxu0 }
 0x508   : > { %v1165_v26 = vpop.f32.mrf.mxu0 }
 0x509   : > { %v3269_v27 = vpack.i.bf16 %v1165_v26, %v1162_v21  ;;  %v1303_v26 = vrot.slane %v3593_v24, %v1302_v19 }
 0x50a   : > { %v3089_v28 = vpop.f32.mrf.mxu0 }
 0x50b   : > { %3270 = vrot.lane.b32.xlu1 %v3269_v27, %s3442_s24 }
 0x56d   : > { %v3261_v29 = vpop.permute.xlu1 %3260 }
 0x56e   : > { %v3263_v31 = vunpack.i.h.bf16 %v3261_v29  ;;  %v3262_v32 = vunpack.i.l.bf16 %v3261_v29 }
 0x570   : > { %v1194_v38 = vsel %vm671_vm3, %v787_v5, %v3263_v31  ;;  %v1193_v40 = vsel %vm671_vm3, %v784_v3, %v3262_v32  ;;  %v3304_v31 = vld [vmem:[%s4042_s6 + $0x38] sm:$0xff]   ;;  %v3305_v32 = vld [vmem:[%s4042_s6 + $0x30] sm:$0xff]  }
 0x575   : > { %v3266_v30 = vpop.permute.xlu0 %3265 }
 0x576   : > { %v3268_v33 = vunpack.i.h.bf16 %v3266_v30  ;;  %v3267_v35 = vunpack.i.l.bf16 %v3266_v30 }
 0x578   : > { %v1196_v43 = vsel %vm723_vm5, %v1194_v38, %v3268_v33  ;;  %v1195_v44 = vsel %vm723_vm5, %v1193_v40, %v3267_v35  ;;  %v3306_v33 = vld [vmem:[%s4042_s6 + $0x28] sm:$0xff]   ;;  %v3307_v35 = vld [vmem:[%s4042_s6 + $0x20] sm:$0xff]   ;;  %v3309_v38 = vld [vmem:[%s4042_s6 + $0x10] sm:$0xff]  }
 0x579   : > { %v3310_v40 = vld [vmem:[%s4042_s6 + $0x8] sm:$0xff]  }
 0x57d   : > { %v3271_v36 = vpop.permute.xlu1 %3270 }
 0x57e   : > { %v3273_v41 = vunpack.i.h.bf16 %v3271_v36  ;;  %v3272_v42 = vunpack.i.l.bf16 %v3271_v36  ;;  %v3308_v36 = vld [vmem:[%s4042_s6 + $0x18] sm:$0xff]  }
 0x580   : > { %v1199_v45 = vsel %vm1197_vm6, %v1196_v43, %v3273_v41  ;;  %v1198_v46 = vsel %vm1197_vm6, %v1195_v44, %v3272_v42  ;;  %v3311_v41 = vld [vmem:[%s4042_s6] sm:$0xff]  }
 0x581   : > { %v1200_v37 = vpack.c.bf16 %v1199_v45, %v1198_v46  ;;  %v2828_v42 = vld [vmem:[%s4044_s8] ss:$0 sm:$0xff] }
 0x583   : > { %3095 = vmatmul.mubr.msk.bf16.vlgmr.msra.gmra.mxu1 %vm499_vm2, %v1200_v37 }
 0x584   : > { %3122 = vmatprep.mubr.msk.bf16.mxu1 %vm3435_vm0, %v3434_v1  ;;  %3107 = vmatpush3.bf16.msra.mxu1 %v3304_v31 }
 0x585   : > { %3108 = vmatprep.subr.bf16.mxu1 %v3434_v1 }
 0x588   : > { %3109 = vmatpush3.bf16.msra.mxu1 %v3305_v32 }
 0x589   : > { %3110 = vmatprep.subr.bf16.mxu1 %v3434_v1 }
 0x58c   : > { %3111 = vmatpush3.bf16.msra.mxu1 %v3306_v33 }
 0x58d   : > { %3112 = vmatprep.subr.bf16.mxu1 %v3434_v1 }
 0x590   : > { %3113 = vmatpush3.bf16.msra.mxu1 %v3307_v35 }
 0x591   : > { %3114 = vmatprep.subr.bf16.mxu1 %v3434_v1 }
 0x594   : > { %3115 = vmatpush3.bf16.msra.mxu1 %v3308_v36 }
 0x595   : > { %3116 = vmatprep.subr.bf16.mxu1 %v3434_v1 }
 0x598   : > { %3117 = vmatpush3.bf16.msra.mxu1 %v3309_v38 }
 0x599   : > { %3118 = vmatprep.subr.bf16.mxu1 %v3434_v1 }
 0x59c   : > { %3119 = vmatpush3.bf16.msra.mxu1 %v3310_v40 }
 0x59d   : > { %3120 = vmatprep.subr.bf16.mxu1 %v3434_v1 }
 0x5a0   : > { %3121 = vmatpush3.bf16.msra.mxu1 %v3311_v41 }
 0x5a1   : > { %3156 = vmatprep.subr.bf16.mxu1 %v3434_v1 }
 0x643   : > { %v1258_v49 = vpop.f32.mrf.mxu1 }
 0x644   : > { %v1259_v50 = vadd.f32 %v1258_v49, %v1208_v48 }
 0x645   : > { %v3096_v51 = vpop.f32.mrf.mxu1 }
 0x646   : > { %v1265_v52 = vadd.f32 %v1259_v50, %v3563_v15 }
 0x647   : > { %v1261_v53 = vpop.f32.mrf.mxu1 }
 0x648   : > { %v1262_v54 = vadd.f32 %v1261_v53, %v1208_v48  ;;  %v1267_v55 = vsel %vm499_vm2, %v1265_v52, 0.0 }
 0x649   : > { %1268 = vadd.xlane.f32.xlu0 %v1267_v55  ;;  %v3097_v56 = vpop.f32.mrf.mxu1 }
 0x64a   : > { %v1266_v57 = vadd.f32 %v1262_v54, %v3565_v16  ;;  %v3302_v16 = vld [vmem:[%s4041_s5 + $0x8] sm:$0xff]  }
 0x64b   : > { %3099 = vmatpush3.bf16.msra.mxu0 %v3302_v16 }
 0x64c   : > { %v1270_v58 = vsel %vm499_vm2, %v1266_v57, 0.0  ;;  %3100 = vmatprep.subr.bf16.mxu0 %v3434_v1 }
 0x64d   : > { %1271 = vadd.xlane.f32.xlu1 %v1270_v58 }
 0x64f   : > { %3101 = vmatpush3.bf16.msra.mxu0 %v3303_v6 }
 0x650   : > { %3126 = vmatprep.subr.bf16.mxu0 %v3434_v1 }
 0x6d2   : > { %v1269_v59 = vpop.xlane.xlu0 %1268 }
 0x6d3   : > { %v1274_v60 = vmul.f32 0.03125, %v1269_v59 }
 0x6d5   : > { %v1276_v61 = vsub.f32 %v1265_v52, %v1274_v60 }
 0x6d6   : > { %v1272_v62 = vpop.xlane.xlu1 %1271 }
 0x6d7   : > { %v1275_v0 = vmul.f32 0.03125, %v1272_v62  ;;  %v1278_v2 = vmul.f32 %v1276_v61, %v1276_v61 }
 0x6d9   : > { %v1277_v3 = vsub.f32 %v1266_v57, %v1275_v0  ;;  %v1280_v15 = vsel %vm499_vm2, %v1278_v2, 0.0 }
 0x6da   : > { %1281 = vadd.xlane.f32.xlu0 %v1280_v15 }
 0x6db   : > { %v1279_v4 = vmul.f32 %v1277_v3, %v1277_v3 }
 0x6dd   : > { %v1283_v5 = vsel %vm499_vm2, %v1279_v4, 0.0 }
 0x6de   : > { %1284 = vadd.xlane.f32.xlu0 %v1283_v5 }
 0x763   : > { %v1282_v7 = vpop.xlane.xlu0 %1281 }
 0x764   : > { %v1286_v8 = vmul.f32 0.03125, %v1282_v7 }
 0x766   : > { %v1288_v9 = vadd.f32 1e-05, %v1286_v8 }
 0x767   : > { %v1285_v10 = vpop.xlane.xlu0 %1284 }
 0x768   : > { %3364 = vrsqrt.f32 %v1288_v9  ;;  %v1287_v11 = vmul.f32 0.03125, %v1285_v10 }
 0x76a   : > { %v1289_v12 = vadd.f32 1e-05, %v1287_v11 }
 0x76c   : > { %3366 = vrsqrt.f32 %v1289_v12 }
 0x775   : > { %v3365_v14 = vpop.eup %3364 }
 0x776   : > { %v1292_v17 = vmul.f32 %v3365_v14, %v1276_v61 }
 0x778   : > { %v1298_v25 = vmul.f32 %v1297_v18, %v1292_v17 }
 0x779   : > { %v3367_v20 = vpop.eup %3366 }
 0x77a   : > { %v1293_v21 = vmul.f32 %v3367_v20, %v1277_v3  ;;  %v3731_v28 = vadd.f32 %v1303_v26, %v1298_v25 }
 0x77c   : > { %v1299_v27 = vmul.f32 %v1297_v18, %v1293_v21 }
 0x77e   : > { %v3733_v29 = vadd.f32 %v1303_v26, %v1299_v27 }
 0x780   : > { %v1306_v30 = vpack.c.bf16 %v3733_v29, %v3731_v28 }
 0x782   : > { %3103 = vmatmul.mubr.msk.bf16.vlgmr.msra.gmra.mxu0 %vm499_vm2, %v1306_v30 }
 0x783   : > { %3130 = vmatprep.mubr.msk.bf16.mxu0 %vm3435_vm0, %v3434_v1 }
 0x842   : > { %v1367_v43 = vpop.f32.mrf.mxu0 }
 0x843   : > { %v1368_v44 = vadd.f32 %v2828_v42, %v1367_v43 }
 0x844   : > { %v3104_v45 = vpop.f32.mrf.mxu0 }
 0x845   : > { %v1376_v46 = vmul.f32 0.70710677, %v1368_v44 }
 0x846   : > { %v1370_v37 = vpop.f32.mrf.mxu0 }
 0x847   : > { %v1378_v48 = vand.u32 2147483647, %v1376_v46  ;;  %v1371_v49 = vadd.f32 %v2828_v42, %v1370_v37  ;;  %vm1418_vm7 = vcmp.ge.f32.partialorder %v1376_v46, 0.0  ;;  %v1374_v42 = vmul.f32 0.5, %v1368_v44 }
 0x848   : > { %v3105_v50 = vpop.f32.mrf.mxu0 }
 0x849   : > { %v1380_v51 = vmul.f32 0.3275911, %v1378_v48  ;;  %v1377_v52 = vmul.f32 0.70710677, %v1371_v49  ;;  %v1406_v57 = vsub.f32 0.0, %v1378_v48  ;;  %v1375_v43 = vmul.f32 0.5, %v1371_v49 }
 0x84b   : > { %v1382_v53 = vadd.f32 1.0, %v1380_v51  ;;  %v1379_v54 = vand.u32 2147483647, %v1377_v52  ;;  %v1408_v58 = vmul.f32 %v1406_v57, %v1378_v48  ;;  %vm1419_vm8 = vcmp.ge.f32.partialorder %v1377_v52, 0.0 }
 0x84c   : > { %v1447_v51 = vsub.s32 4, %v3587_v22 }
 0x84d   : > { %3368 = vrcp.f32 %v1382_v53  ;;  %v1381_v55 = vmul.f32 0.3275911, %v1379_v54  ;;  %v1407_v59 = vsub.f32 0.0, %v1379_v54  ;;  %v1410_v62 = vmul.f32 1.442695, %v1408_v58 }
 0x84e   : > { %v1448_v46 = vrot.slane %v3593_v24, %v1447_v51 }
 0x84f   : > { %v1383_v56 = vadd.f32 1.0, %v1381_v55  ;;  %v1409_v0 = vmul.f32 %v1407_v59, %v1379_v54 }
 0x851   : > { %3370 = vrcp.f32 %v1383_v56  ;;  %v1412_v5 = vmul.f32 1.442695, %v1409_v0 }
 0x852   : > { %3372 = vpow2.f32 %v1410_v62 }
 0x853   : > { %3374 = vpow2.f32 %v1412_v5 }
 0x85a   : > { %v3369_v60 = vpop.eup %3368 }
 0x85b   : > { %v1388_v61 = vmul.f32 1.0614054, %v3369_v60 }
 0x85d   : > { %v1390_v2 = vadd.f32 -1.4531521, %v1388_v61 }
 0x85e   : > { %v3371_v3 = vpop.eup %3370 }
 0x85f   : > { %v1392_v15 = vmul.f32 %v3369_v60, %v1390_v2  ;;  %v1389_v4 = vmul.f32 1.0614054, %v3371_v3  ;;  %v3373_v21 = vpop.eup %3372 }
 0x860   : > { %v3375_v31 = vpop.eup %3374 }
 0x861   : > { %v1394_v16 = vadd.f32 1.4214138, %v1392_v15  ;;  %v1391_v6 = vadd.f32 -1.4531521, %v1389_v4 }
 0x863   : > { %v1396_v7 = vmul.f32 %v3369_v60, %v1394_v16  ;;  %v1393_v8 = vmul.f32 %v3371_v3, %v1391_v6  ;;  %v3313_v16 = vld [vmem:[%s4039_s3 + $0x30] sm:$0xff]  }
 0x865   : > { %v1398_v9 = vadd.f32 -0.28449672, %v1396_v7  ;;  %v1395_v10 = vadd.f32 1.4214138, %v1393_v8 }
 0x867   : > { %v1400_v11 = vmul.f32 %v3369_v60, %v1398_v9  ;;  %v1397_v12 = vmul.f32 %v3371_v3, %v1395_v10 }
 0x869   : > { %v1402_v14 = vadd.f32 0.2548296, %v1400_v11  ;;  %v1399_v17 = vadd.f32 -0.28449672, %v1397_v12  ;;  %v1568_v12 = vsub.s32 7, %v3587_v22 }
 0x86b   : > { %v1404_v18 = vmul.f32 %v3369_v60, %v1402_v14  ;;  %v1401_v20 = vmul.f32 %v3371_v3, %v1399_v17 }
 0x86d   : > { %v1414_v25 = vmul.f32 %v3373_v21, %v1404_v18  ;;  %v1403_v26 = vadd.f32 0.2548296, %v1401_v20  ;;  %v1569_v18 = vrot.slane %v3593_v24, %v1568_v12  ;;  %v478_v20 = vld [vmem:[%s4043_s7 + $0x8] sm:$0xff] }
 0x86f   : > { %v1416_v27 = vsub.f32 1.0, %v1414_v25  ;;  %v1405_v30 = vmul.f32 %v3371_v3, %v1403_v26 }
 0x871   : > { %v1420_v32 = vsub.f32 0.0, %v1416_v27  ;;  %v1415_v33 = vmul.f32 %v3375_v31, %v1405_v30 }
 0x873   : > { %v1422_v35 = vsel %vm1418_vm7, %v1416_v27, %v1420_v32  ;;  %v1417_v36 = vsub.f32 1.0, %v1415_v33  ;;  %v1575_v27 = vrot.slane %v478_v20, %v3602_v39  ;;  %v3314_v33 = vld [vmem:[%s4039_s3 + $0x48] sm:$0xff]  }
 0x874   : > { %v1424_v40 = vadd.f32 1.0, %v1422_v35  ;;  %v3315_v35 = vld [vmem:[%s4039_s3 + $0x40] sm:$0xff]  }
 0x875   : > { %v1421_v38 = vsub.f32 0.0, %v1417_v36 }
 0x876   : > { %v1426_v37 = vmul.f32 %v1424_v40, %v1374_v42  ;;  %v3837_v40 = vld [vmem:[%s4043_s7 + $0x10] sm:$0xff] }
 0x877   : > { %v1423_v41 = vsel %vm1419_vm8, %v1417_v36, %v1421_v38  ;;  %v3316_v36 = vld [vmem:[%s4039_s3 + $0x58] sm:$0xff]   ;;  %v3317_v38 = vld [vmem:[%s4039_s3 + $0x50] sm:$0xff]   ;;  %v1590_v42 = vrot.slane %v3837_v40, %v3602_v39 }
 0x878   : > { %v1425_v45 = vadd.f32 1.0, %v1423_v41 }
 0x87a   : > { %v1427_v48 = vmul.f32 %v1425_v45, %v1375_v43 }
 0x87c   : > { %v1428_v50 = vpack.c.bf16 %v1427_v48, %v1426_v37 }
 0x87e   : > { %3123 = vmatmul.mubr.bf16.vlgmr.msra.gmra.mxu1 %v1428_v50 }
 0x87f   : > { %3158 = vmatprep.mubr.msk.bf16.mxu1 %vm3435_vm0, %v3434_v1 }
 0x93e   : > { %v1531_v53 = vpop.f32.mrf.mxu1 }
 0x93f   : > { %v1532_v54 = vadd.f32 %v1531_v53, %v1448_v46 }
 0x940   : > { %v3124_v52 = vpop.f32.mrf.mxu1 }
 0x941   : > { %v1538_v44 = vadd.f32 %v1532_v54, %v3731_v28  ;;  %v1655_v54 = vrot.slane %v3837_v40, %v551_v34 }
 0x942   : > { %v1534_v49 = vpop.f32.mrf.mxu1 }
 0x943   : > { %v1535_v55 = vadd.f32 %v1534_v49, %v1448_v46  ;;  %v1540_v56 = vsel %vm499_vm2, %v1538_v44, 0.0 }
 0x944   : > { %1541 = vadd.xlane.f32.xlu1 %v1540_v56  ;;  %v3125_v57 = vpop.f32.mrf.mxu1 }
 0x945   : > { %v1539_v58 = vadd.f32 %v1535_v55, %v3733_v29  ;;  %v3312_v29 = vld [vmem:[%s4039_s3 + $0x38] sm:$0xff]  }
 0x946   : > { %3127 = vmatpush3.bf16.msra.mxu0 %v3312_v29 }
 0x947   : > { %v1543_v59 = vsel %vm499_vm2, %v1539_v58, 0.0  ;;  %3128 = vmatprep.subr.bf16.mxu0 %v3434_v1 }
 0x948   : > { %1544 = vadd.xlane.f32.xlu0 %v1543_v59  ;;  %v1717_v59 = vrot.slane %v3837_v40, %v613_v23 }
 0x94a   : > { %3129 = vmatpush3.bf16.msra.mxu0 %v3313_v16 }
 0x94b   : > { %3134 = vmatprep.subr.bf16.mxu0 %v3434_v1 }
 0x9cd   : > { %v1542_v60 = vpop.xlane.xlu1 %1541 }
 0x9ce   : > { %v1546_v61 = vmul.f32 0.03125, %v1542_v60 }
 0x9d0   : > { %v1548_v62 = vsub.f32 %v1538_v44, %v1546_v61 }
 0x9d1   : > { %v1545_v0 = vpop.xlane.xlu0 %1544 }
 0x9d2   : > { %v1547_v2 = vmul.f32 0.03125, %v1545_v0  ;;  %v1550_v3 = vmul.f32 %v1548_v62, %v1548_v62 }
 0x9d4   : > { %v1549_v15 = vsub.f32 %v1539_v58, %v1547_v2  ;;  %v1552_v28 = vsel %vm499_vm2, %v1550_v3, 0.0 }
 0x9d5   : > { %1553 = vadd.xlane.f32.xlu1 %v1552_v28 }
 0x9d6   : > { %v1551_v4 = vmul.f32 %v1549_v15, %v1549_v15 }
 0x9d8   : > { %v1555_v5 = vsel %vm499_vm2, %v1551_v4, 0.0 }
 0x9d9   : > { %1556 = vadd.xlane.f32.xlu0 %v1555_v5 }
 0xa5e   : > { %v1554_v6 = vpop.xlane.xlu1 %1553 }
 0xa5f   : > { %v1558_v7 = vmul.f32 0.03125, %v1554_v6 }
 0xa61   : > { %v1560_v8 = vadd.f32 1e-05, %v1558_v7 }
 0xa62   : > { %v1557_v9 = vpop.xlane.xlu0 %1556 }
 0xa63   : > { %3376 = vrsqrt.f32 %v1560_v8  ;;  %v1559_v10 = vmul.f32 0.03125, %v1557_v9 }
 0xa65   : > { %v1561_v11 = vadd.f32 1e-05, %v1559_v10 }
 0xa67   : > { %3378 = vrsqrt.f32 %v1561_v11 }
 0xa70   : > { %v3377_v14 = vpop.eup %3376 }
 0xa71   : > { %v1564_v17 = vmul.f32 %v3377_v14, %v1548_v62 }
 0xa73   : > { %v1570_v26 = vmul.f32 %v1569_v18, %v1564_v17 }
 0xa74   : > { %v3379_v21 = vpop.eup %3378 }
 0xa75   : > { %v1565_v25 = vmul.f32 %v3379_v21, %v1549_v15  ;;  %v3803_v31 = vadd.f32 %v1575_v27, %v1570_v26 }
 0xa77   : > { %v1571_v30 = vmul.f32 %v1569_v18, %v1565_v25 }
 0xa79   : > { %v3805_v32 = vadd.f32 %v1575_v27, %v1571_v30 }
 0xa7b   : > { %v1578_v24 = vpack.c.bf16 %v3805_v32, %v3803_v31 }
 0xa7d   : > { %3131 = vmatmul.mubr.msk.bf16.vlgmr.msra.gmra.mxu0 %vm499_vm2, %v1578_v24 }
 0xa7e   : > { %3135 = vmatpush3.bf16.msra.mxu0 %v3314_v33  ;;  %3138 = vmatprep.mubr.msk.bf16.mxu0 %vm3435_vm0, %v3434_v1 }
 0xa7f   : > { %3136 = vmatprep.subr.bf16.mxu0 %v3434_v1 }
 0xa82   : > { %3137 = vmatpush3.bf16.msra.mxu0 %v3315_v35 }
 0xa83   : > { %3142 = vmatprep.subr.bf16.mxu0 %v3434_v1 }
 0xa85   : > { %3139 = vmatmul.mubr.msk.bf16.vlgmr.msra.gmra.mxu0 %vm499_vm2, %v1578_v24 }
 0xa86   : > { %3143 = vmatpush3.bf16.msra.mxu0 %v3316_v36  ;;  %3146 = vmatprep.mubr.msk.bf16.mxu0 %vm3435_vm0, %v3434_v1 }
 0xa87   : > { %3144 = vmatprep.subr.bf16.mxu0 %v3434_v1 }
 0xa8a   : > { %3145 = vmatpush3.bf16.msra.mxu0 %v3317_v38 }
 0xa8b   : > { %3150 = vmatprep.subr.bf16.mxu0 %v3434_v1 }
 0xa8d   : > { %3147 = vmatmul.mubr.msk.bf16.vlgmr.msra.gmra.mxu0 %vm499_vm2, %v1578_v24 }
 0xa8e   : > { %3152 = vmatprep.mubr.msk.bf16.mxu0 %vm3435_vm0, %v3434_v1 }
 0xb3d   : > { %v1640_v41 = vpop.f32.mrf.mxu0 }
 0xb3e   : > { %v1641_v37 = vadd.f32 %v1640_v41, %v1590_v42 }
 0xb3f   : > { %v3132_v43 = vpop.f32.mrf.mxu0 }
 0xb41   : > { %v1643_v45 = vpop.f32.mrf.mxu0 }
 0xb42   : > { %v1644_v48 = vadd.f32 %v1643_v45, %v1590_v42 }
 0xb43   : > { %v3133_v50 = vpop.f32.mrf.mxu0 }
 0xb44   : > { %v1771_v46 = vpack.c.bf16 %v1644_v48, %v1641_v37 }
 0xb45   : > { %v1702_v53 = vpop.f32.mrf.mxu0 }
 0xb46   : > { %1893 = vrot.lane.b32.xlu0 %v1771_v46, %s3437_s14  ;;  %v1703_v49 = vadd.f32 %v1702_v53, %v1655_v54 }
 0xb47   : > { %v3140_v52 = vpop.f32.mrf.mxu0 }
 0xb49   : > { %v1705_v44 = vpop.f32.mrf.mxu0 }
 0xb4a   : > { %v1706_v55 = vadd.f32 %v1705_v44, %v1655_v54 }
 0xb4b   : > { %v3141_v56 = vpop.f32.mrf.mxu0 }
 0xb4c   : > { %v1772_v57 = vpack.c.bf16 %v1706_v55, %v1703_v49 }
 0xb4d   : > { %v1764_v58 = vpop.f32.mrf.mxu0 }
 0xb4e   : > { %2147 = vrot.lane.b32.xlu0 %v1772_v57, %s3438_s15  ;;  %1896 = vrot.lane.b32.xlu1 %v1772_v57, %s3437_s14  ;;  %v1778_v60 = vsel %vm671_vm3, %v1772_v57, 0  ;;  %v1765_v62 = vadd.f32 %v1764_v58, %v1717_v59 }
 0xb4f   : > { %v3148_v34 = vpop.f32.mrf.mxu0  ;;  %3151 = vmatpush3.bf16.xpose.msra.mxu0 %v1778_v60 }
 0xb50   : > { %3162 = vmatprep.subr.bf16.mxu0 %v3434_v1 }
 0xb51   : > { %v1767_v61 = vpop.f32.mrf.mxu0 }
 0xb52   : > { %v1768_v0 = vadd.f32 %v1767_v61, %v1717_v59  ;;  %2022 = vrot.lane.b32.xlu1 %v1772_v57, %s3436_s13 }
 0xb53   : > { %v3149_v2 = vpop.f32.mrf.mxu0 }
 0xb54   : > { %v3853_v3 = vpack.c.bf16 %v1768_v0, %v1765_v62 }
 0xb56   : > { %2020 = vrot.lane.b32.xlu1 %v1771_v46, %s3436_s13  ;;  %3153 = vmatmul.mubr.msk.bf16.vlgmr.msra.gmra.mxu0 %vm671_vm3, %v1771_v46 }
 0xb57   : > { %3157 = vmatpush3.bf16.msra.mxu1 %v3853_v3  ;;  %3164 = vmatprep.mubr.msk.bf16.mxu0 %vm3435_vm0, %v3434_v1 }
 0xb58   : > { %3168 = vmatprep.subr.bf16.mxu1 %v3434_v1 }
 0xb5a   : > { %2145 = vrot.lane.b32.xlu1 %v1771_v46, %s3438_s15 }
 0xbb8   : > { %v1894_v4 = vpop.permute.xlu0 %1893 }
 0xbc0   : > { %v1897_v23 = vpop.permute.xlu1 %1896  ;;  %v2148_v29 = vpop.permute.xlu0 %2147 }
 0xbc1   : > { %v1902_v15 = vsel %vm671_vm3, %v1897_v23, 0  ;;  %v2153_v6 = vsel %vm671_vm3, %v2148_v29, 0 }
 0xbc2   : > { %3163 = vmatpush3.bf16.xpose.msra.mxu0 %v1902_v15 }
 0xbc3   : > { %3174 = vmatprep.subr.bf16.mxu0 %v3434_v1 }
 0xbc4   : > { %v2023_v28 = vpop.permute.xlu1 %2022 }
 0xbc5   : > { %v2028_v5 = vsel %vm671_vm3, %v2023_v28, 0 }
 0xbc8   : > { %v2021_v16 = vpop.permute.xlu1 %2020 }
 0xbc9   : > { %3165 = vmatmul.mubr.msk.bf16.vlgmr.msra.gmra.mxu0 %vm671_vm3, %v1894_v4 }
 0xbca   : > { %3175 = vmatpush3.bf16.xpose.msra.mxu0 %v2028_v5  ;;  %3176 = vmatprep.mubr.msk.bf16.mxu0 %vm3435_vm0, %v3434_v1 }
 0xbcb   : > { %3186 = vmatprep.subr.bf16.mxu0 %v3434_v1 }
 0xbcc   : > { %v2146_v7 = vpop.permute.xlu1 %2145 }
 0xbd1   : > { %3177 = vmatmul.mubr.msk.bf16.vlgmr.msra.gmra.mxu0 %vm671_vm3, %v2021_v16 }
 0xbd2   : > { %3187 = vmatpush3.bf16.xpose.msra.mxu0 %v2153_v6  ;;  %3188 = vmatprep.mubr.msk.bf16.mxu0 %vm3435_vm0, %v3434_v1 }
 0xbd3   : > { %3198 = vmatprep.subr.bf16.mxu0 %v3434_v1 }
 0xbd9   : > { %3189 = vmatmul.mubr.msk.bf16.vlgmr.msra.gmra.mxu0 %vm671_vm3, %v2146_v7 }
 0xbda   : > { %3202 = vmatprep.mubr.msk.bf16.mxu0 %vm3435_vm0, %v3434_v1 }
 0xc16   : > { %v1814_v8 = vpop.f32.mrf.mxu0 }
 0xc17   : > { %v1821_v9 = vmul.f32 0.35355338, %v1814_v8 }
 0xc18   : > { %v3154_v10 = vpop.f32.mrf.mxu0 }
 0xc19   : > { %v1823_v11 = vadd.f32 %v1821_v9, %v3638_v63 }
 0xc1a   : > { %v1817_v14 = vpop.f32.mrf.mxu0 }
 0xc1b   : > { %v1822_v17 = vmul.f32 0.35355338, %v1817_v14  ;;  %v1825_v18 = vsel %vm723_vm5, %v1823_v11, -inf }
 0xc1c   : > { %1826 = vmax.xlane.f32.xlu0 %v1825_v18  ;;  %v3155_v20 = vpop.f32.mrf.mxu0 }
 0xc1d   : > { %v1824_v21 = vadd.f32 %v1822_v17, %v3638_v63 }
 0xc1f   : > { %v1828_v25 = vsel %vm723_vm5, %v1824_v21, -inf }
 0xc20   : > { %1829 = vmax.xlane.f32.xlu1 %v1828_v25 }
 0xc89   : > { %v1938_v26 = vpop.f32.mrf.mxu0 }
 0xc8a   : > { %v1945_v27 = vmul.f32 0.35355338, %v1938_v26 }
 0xc8b   : > { %v3166_v30 = vpop.f32.mrf.mxu0 }
 0xc8c   : > { %v1947_v33 = vadd.f32 %v1945_v27, %v3638_v63 }
 0xc8d   : > { %v1941_v24 = vpop.f32.mrf.mxu0 }
 0xc8e   : > { %v1946_v35 = vmul.f32 0.35355338, %v1941_v24  ;;  %v1949_v36 = vsel %vm723_vm5, %v1947_v33, -inf }
 0xc8f   : > { %1950 = vmax.xlane.f32.xlu0 %v1949_v36  ;;  %v3167_v38 = vpop.f32.mrf.mxu0 }
 0xc90   : > { %v1948_v41 = vadd.f32 %v1946_v35, %v3638_v63 }
 0xc91   : > { %v2064_v42 = vpop.f32.mrf.mxu0 }
 0xc92   : > { %v2071_v43 = vmul.f32 0.35355338, %v2064_v42  ;;  %v1952_v45 = vsel %vm723_vm5, %v1948_v41, -inf }
 0xc93   : > { %1953 = vmax.xlane.f32.xlu0 %v1952_v45  ;;  %v3178_v37 = vpop.f32.mrf.mxu0 }
 0xc94   : > { %v2073_v48 = vadd.f32 %v2071_v43, %v3638_v63 }
 0xc95   : > { %v2067_v50 = vpop.f32.mrf.mxu0 }
 0xc96   : > { %v2072_v46 = vmul.f32 0.35355338, %v2067_v50  ;;  %v2075_v53 = vsel %vm723_vm5, %v2073_v48, -inf }
 0xc97   : > { %2076 = vmax.xlane.f32.xlu1 %v2075_v53  ;;  %v3179_v54 = vpop.f32.mrf.mxu0 }
 0xc98   : > { %v2074_v52 = vadd.f32 %v2072_v46, %v3638_v63 }
 0xc99   : > { %v2189_v44 = vpop.f32.mrf.mxu0 }
 0xc9a   : > { %v2196_v49 = vmul.f32 0.35355338, %v2189_v44  ;;  %v2078_v55 = vsel %vm723_vm5, %v2074_v52, -inf }
 0xc9b   : > { %2079 = vmax.xlane.f32.xlu0 %v2078_v55  ;;  %v3190_v56 = vpop.f32.mrf.mxu0 }
 0xc9c   : > { %v2198_v57 = vadd.f32 %v2196_v49, %v3638_v63 }
 0xc9d   : > { %v2192_v58 = vpop.f32.mrf.mxu0 }
 0xc9e   : > { %v2197_v59 = vmul.f32 0.35355338, %v2192_v58  ;;  %v2200_v60 = vsel %vm723_vm5, %v2198_v57, -inf }
 0xc9f   : > { %2201 = vmax.xlane.f32.xlu1 %v2200_v60  ;;  %v3191_v34 = vpop.f32.mrf.mxu0 }
 0xca0   : > { %v2199_v61 = vadd.f32 %v2197_v59, %v3638_v63 }
 0xca2   : > { %v2203_v62 = vsel %vm723_vm5, %v2199_v61, -inf }
 0xca3   : > { %2204 = vmax.xlane.f32.xlu0 %v2203_v62 }
 0xca5   : > { %v1827_v0 = vpop.xlane.xlu0 %1826 }
 0xca6   : > { %v1831_v2 = vsub.f32 %v1823_v11, %v1827_v0 }
 0xca8   : > { %v1833_v23 = vmul.f32 1.442695, %v1831_v2 }
 0xca9   : > { %v1830_v15 = vpop.xlane.xlu1 %1829 }
 0xcaa   : > { %3380 = vpow2.f32 %v1833_v23  ;;  %v1832_v28 = vsub.f32 %v1824_v21, %v1830_v15 }
 0xcac   : > { %v1835_v4 = vmul.f32 1.442695, %v1832_v28 }
 0xcae   : > { %3382 = vpow2.f32 %v1835_v4 }
 0xcb7   : > { %v3381_v5 = vpop.eup %3380 }
 0xcb8   : > { %v1837_v29 = vsel %vm723_vm5, %v3381_v5, 0.0 }
 0xcb9   : > { %1838 = vadd.xlane.f32.xlu1 %v1837_v29 }
 0xcbb   : > { %v3383_v16 = vpop.eup %3382 }
 0xcbc   : > { %v1840_v6 = vsel %vm723_vm5, %v3383_v16, 0.0 }
 0xcbd   : > { %1841 = vadd.xlane.f32.xlu0 %v1840_v6 }
 0xcca   : > { %1973 = vrot.lane.b32.xlu1 %v3853_v3, %s3437_s14 }
 0xd18   : > { %v1951_v63 = vpop.xlane.xlu0 %1950 }
 0xd19   : > { %v1955_v7 = vsub.f32 %v1947_v33, %v1951_v63 }
 0xd1b   : > { %v1957_v8 = vmul.f32 1.442695, %v1955_v7 }
 0xd1c   : > { %v1954_v9 = vpop.xlane.xlu0 %1953 }
 0xd1d   : > { %3384 = vpow2.f32 %v1957_v8  ;;  %v1956_v10 = vsub.f32 %v1948_v41, %v1954_v9 }
 0xd1f   : > { %v1959_v11 = vmul.f32 1.442695, %v1956_v10 }
 0xd20   : > { %v2077_v14 = vpop.xlane.xlu1 %2076 }
 0xd21   : > { %3386 = vpow2.f32 %v1959_v11  ;;  %v2081_v17 = vsub.f32 %v2073_v48, %v2077_v14 }
 0xd23   : > { %v2083_v18 = vmul.f32 1.442695, %v2081_v17 }
 0xd24   : > { %v2080_v20 = vpop.xlane.xlu0 %2079 }
 0xd25   : > { %3388 = vpow2.f32 %v2083_v18  ;;  %v2082_v21 = vsub.f32 %v2074_v52, %v2080_v20 }
 0xd27   : > { %v2085_v25 = vmul.f32 1.442695, %v2082_v21 }
 0xd28   : > { %v2202_v26 = vpop.xlane.xlu1 %2201 }
 0xd29   : > { %3390 = vpow2.f32 %v2085_v25  ;;  %v2206_v27 = vsub.f32 %v2198_v57, %v2202_v26 }
 0xd2a   : > { %v3385_v30 = vpop.eup %3384 }
 0xd2b   : > { %v2208_v24 = vmul.f32 1.442695, %v2206_v27  ;;  %v1961_v33 = vsel %vm723_vm5, %v3385_v30, 0.0 }
 0xd2c   : > { %1962 = vadd.xlane.f32.xlu1 %v1961_v33  ;;  %v2205_v35 = vpop.xlane.xlu0 %2204 }
 0xd2d   : > { %3392 = vpow2.f32 %v2208_v24  ;;  %v2207_v36 = vsub.f32 %v2199_v61, %v2205_v35  ;;  %v3318_v24 = vld [vmem:[%s4040_s4 + $0x18] sm:$0xff]  }
 0xd2e   : > { %v3387_v38 = vpop.eup %3386  ;;  %3199 = vmatpush3.bf16.msra.mxu0 %v3318_v24 }
 0xd2f   : > { %v2210_v41 = vmul.f32 1.442695, %v2207_v36  ;;  %v1964_v42 = vsel %vm723_vm5, %v3387_v38, 0.0  ;;  %3200 = vmatprep.subr.bf16.mxu0 %v3434_v1 }
 0xd30   : > { %1965 = vadd.xlane.f32.xlu0 %v1964_v42  ;;  %v3319_v42 = vld [vmem:[%s4040_s4 + $0x10] sm:$0xff]  }
 0xd31   : > { %3394 = vpow2.f32 %v2210_v41 }
 0xd32   : > { %v3389_v43 = vpop.eup %3388  ;;  %3201 = vmatpush3.bf16.msra.mxu0 %v3319_v42 }
 0xd33   : > { %v2087_v45 = vsel %vm723_vm5, %v3389_v43, 0.0  ;;  %3214 = vmatprep.subr.bf16.mxu0 %v3434_v1 }
 0xd34   : > { %2088 = vadd.xlane.f32.xlu1 %v2087_v45 }
 0xd36   : > { %v3391_v37 = vpop.eup %3390 }
 0xd37   : > { %v2090_v48 = vsel %vm723_vm5, %v3391_v37, 0.0 }
 0xd38   : > { %2091 = vadd.xlane.f32.xlu0 %v2090_v48 }
 0xd3a   : > { %v3393_v50 = vpop.eup %3392 }
 0xd3b   : > { %v2212_v46 = vsel %vm723_vm5, %v3393_v50, 0.0 }
 0xd3c   : > { %2213 = vadd.xlane.f32.xlu1 %v2212_v46 }
 0xd3e   : > { %v3395_v53 = vpop.eup %3394 }
 0xd3f   : > { %v2215_v54 = vsel %vm723_vm5, %v3395_v53, 0.0 }
 0xd40   : > { %2216 = vadd.xlane.f32.xlu0 %v2215_v54 }
 0xd42   : > { %v1839_v52 = vpop.xlane.xlu1 %1838 }
 0xd43   : > { %3396 = vrcp.f32 %v1839_v52 }
 0xd46   : > { %v1842_v44 = vpop.xlane.xlu0 %1841  ;;  %v1974_v59 = vpop.permute.xlu1 %1973 }
 0xd47   : > { %3398 = vrcp.f32 %v1842_v44 }
 0xd4d   : > { %2223 = vrot.lane.b32.xlu1 %v3853_v3, %s3438_s15 }
 0xd50   : > { %v3397_v49 = vpop.eup %3396 }
 0xd51   : > { %v1845_v56 = vmul.f32 %v3397_v49, %v3381_v5 }
 0xd54   : > { %v3399_v55 = vpop.eup %3398 }
 0xd55   : > { %v1846_v57 = vmul.f32 %v3399_v55, %v3383_v16 }
 0xd56   : > { %2098 = vrot.lane.b32.xlu0 %v3853_v3, %s3436_s13 }
 0xd57   : > { %v1847_v58 = vpack.c.bf16 %v1846_v57, %v1845_v56 }
 0xd59   : > { %3159 = vmatmul.mubr.msk.bf16.vlgmr.msra.gmra.mxu1 %vm723_vm5, %v1847_v58 }
 0xd5a   : > { %3169 = vmatpush3.bf16.msra.mxu1 %v1974_v59  ;;  %3170 = vmatprep.mubr.msk.bf16.mxu1 %vm3435_vm0, %v3434_v1 }
 0xd5b   : > { %3180 = vmatprep.subr.bf16.mxu1 %v3434_v1 }
 0xdb5   : > { %v1963_v60 = vpop.xlane.xlu1 %1962 }
 0xdb6   : > { %3400 = vrcp.f32 %v1963_v60 }
 0xdb9   : > { %v1966_v34 = vpop.xlane.xlu0 %1965 }
 0xdba   : > { %3402 = vrcp.f32 %v1966_v34 }
 0xdbd   : > { %v2089_v61 = vpop.xlane.xlu1 %2088 }
 0xdbe   : > { %3404 = vrcp.f32 %v2089_v61 }
 0xdc1   : > { %v2092_v62 = vpop.xlane.xlu0 %2091 }
 0xdc2   : > { %3406 = vrcp.f32 %v2092_v62 }
 0xdc3   : > { %v3401_v0 = vpop.eup %3400 }
 0xdc4   : > { %v1969_v23 = vmul.f32 %v3401_v0, %v3385_v30 }
 0xdc5   : > { %v2214_v3 = vpop.xlane.xlu1 %2213 }
 0xdc6   : > { %3408 = vrcp.f32 %v2214_v3 }
 0xdc7   : > { %v3403_v2 = vpop.eup %3402 }
 0xdc8   : > { %v1970_v15 = vmul.f32 %v3403_v2, %v3387_v38 }
 0xdc9   : > { %v2217_v28 = vpop.xlane.xlu0 %2216  ;;  %v2224_v8 = vpop.permute.xlu1 %2223 }
 0xdca   : > { %3410 = vrcp.f32 %v2217_v28  ;;  %v1971_v4 = vpack.c.bf16 %v1970_v15, %v1969_v23  ;;  %v2309_v23 = vrot.slane %v3837_v40, %v1207_v47 }
 0xdcb   : > { %v3405_v5 = vpop.eup %3404 }
 0xdcc   : > { %3171 = vmatmul.mubr.msk.bf16.vlgmr.msra.gmra.mxu1 %vm723_vm5, %v1971_v4  ;;  %v2095_v6 = vmul.f32 %v3405_v5, %v3389_v43 }
 0xdcd   : > { %v2099_v29 = vpop.permute.xlu0 %2098  ;;  %3182 = vmatprep.mubr.msk.bf16.mxu1 %vm3435_vm0, %v3434_v1 }
 0xdce   : > { %3181 = vmatpush3.bf16.msra.mxu1 %v2099_v29 }
 0xdcf   : > { %v3407_v16 = vpop.eup %3406  ;;  %3192 = vmatprep.subr.bf16.mxu1 %v3434_v1 }
 0xdd0   : > { %v2096_v63 = vmul.f32 %v3407_v16, %v3391_v37 }
 0xdd2   : > { %v2097_v7 = vpack.c.bf16 %v2096_v63, %v2095_v6 }
 0xdd3   : > { %v3409_v9 = vpop.eup %3408 }
 0xdd4   : > { %3183 = vmatmul.mubr.msk.bf16.vlgmr.msra.gmra.mxu1 %vm723_vm5, %v2097_v7  ;;  %v2220_v11 = vmul.f32 %v3409_v9, %v3393_v50 }
 0xdd5   : > { %3193 = vmatpush3.bf16.msra.mxu1 %v2224_v8  ;;  %3194 = vmatprep.mubr.msk.bf16.mxu1 %vm3435_vm0, %v3434_v1 }
 0xdd6   : > { %3206 = vmatprep.subr.bf16.mxu1 %v3434_v1 }
 0xdd7   : > { %v3411_v10 = vpop.eup %3410 }
 0xdd8   : > { %v2221_v14 = vmul.f32 %v3411_v10, %v3395_v53 }
 0xdda   : > { %v2222_v17 = vpack.c.bf16 %v2221_v14, %v2220_v11 }
 0xddc   : > { %3195 = vmatmul.mubr.msk.bf16.vlgmr.msra.gmra.mxu1 %vm723_vm5, %v2222_v17 }
 0xddd   : > { %3210 = vmatprep.mubr.msk.bf16.mxu1 %vm3435_vm0, %v3434_v1 }
 0xe19   : > { %v1885_v18 = vpop.f32.mrf.mxu1 }
 0xe1b   : > { %v3160_v20 = vpop.f32.mrf.mxu1 }
 0xe1d   : > { %v1888_v21 = vpop.f32.mrf.mxu1 }
 0xe1f   : > { %v3161_v25 = vpop.f32.mrf.mxu1 }
 0xe20   : > { %v3321_v25 = vld [vmem:[%s4041_s5 + $0x10] sm:$0xff]  }
 0xe8c   : > { %v2013_v26 = vpop.f32.mrf.mxu1 }
 0xe8e   : > { %v3172_v27 = vpop.f32.mrf.mxu1 }
 0xe90   : > { %v2016_v30 = vpop.f32.mrf.mxu1 }
 0xe91   : > { %v3274_v33 = vpack.i.bf16 %v2016_v30, %v2013_v26 }
 0xe92   : > { %v3173_v35 = vpop.f32.mrf.mxu1 }
 0xe93   : > { %3275 = vrot.lane.b32.xlu1 %v3274_v33, %s3440_s20 }
 0xe94   : > { %v2138_v36 = vpop.f32.mrf.mxu1 }
 0xe96   : > { %v3184_v38 = vpop.f32.mrf.mxu1 }
 0xe98   : > { %v2141_v41 = vpop.f32.mrf.mxu1 }
 0xe99   : > { %v3279_v43 = vpack.i.bf16 %v2141_v41, %v2138_v36  ;;  %v2397_v41 = vrot.slane %v3837_v40, %v1296_v13  ;;  %v3322_v13 = vld [vmem:[%s4042_s6 + $0x78] sm:$0xff]  }
 0xe9a   : > { %v3185_v45 = vpop.f32.mrf.mxu1 }
 0xe9b   : > { %3280 = vrot.lane.b32.xlu0 %v3279_v43, %s3441_s23 }
 0xe9c   : > { %v2263_v37 = vpop.f32.mrf.mxu1 }
 0xe9e   : > { %v3196_v48 = vpop.f32.mrf.mxu1 }
 0xea0   : > { %v2266_v50 = vpop.f32.mrf.mxu1 }
 0xea1   : > { %v3284_v46 = vpack.i.bf16 %v2266_v50, %v2263_v37  ;;  %v2403_v37 = vrot.slane %v3837_v40, %v1302_v19  ;;  %v3323_v19 = vld [vmem:[%s4042_s6 + $0x70] sm:$0xff]  }
 0xea2   : > { %v3197_v53 = vpop.f32.mrf.mxu1 }
 0xea3   : > { %3285 = vrot.lane.b32.xlu1 %v3284_v46, %s3442_s24 }
 0xf05   : > { %v3276_v54 = vpop.permute.xlu1 %3275 }
 0xf06   : > { %v3278_v44 = vunpack.i.h.bf16 %v3276_v54  ;;  %v3277_v49 = vunpack.i.l.bf16 %v3276_v54  ;;  %v3324_v54 = vld [vmem:[%s4042_s6 + $0x68] sm:$0xff]  }
 0xf08   : > { %v2295_v58 = vsel %vm671_vm3, %v1888_v21, %v3278_v44  ;;  %v2294_v59 = vsel %vm671_vm3, %v1885_v18, %v3277_v49  ;;  %v3326_v44 = vld [vmem:[%s4042_s6 + $0x58] sm:$0xff]   ;;  %v3327_v49 = vld [vmem:[%s4042_s6 + $0x50] sm:$0xff]  }
 0xf0d   : > { %v3281_v52 = vpop.permute.xlu0 %3280 }
 0xf0e   : > { %v3283_v55 = vunpack.i.h.bf16 %v3281_v52  ;;  %v3282_v56 = vunpack.i.l.bf16 %v3281_v52  ;;  %v3325_v52 = vld [vmem:[%s4042_s6 + $0x60] sm:$0xff]  }
 0xf10   : > { %v2297_v61 = vsel %vm723_vm5, %v2295_v58, %v3283_v55  ;;  %v2296_v62 = vsel %vm723_vm5, %v2294_v59, %v3282_v56  ;;  %v3328_v55 = vld [vmem:[%s4042_s6 + $0x48] sm:$0xff]   ;;  %v3329_v56 = vld [vmem:[%s4042_s6 + $0x40] sm:$0xff]  }
 0xf15   : > { %v3286_v57 = vpop.permute.xlu1 %3285 }
 0xf16   : > { %v3288_v60 = vunpack.i.h.bf16 %v3286_v57  ;;  %v3287_v34 = vunpack.i.l.bf16 %v3286_v57  ;;  %v2883_v57 = vld [vmem:[%s4044_s8 + $0x1] ss:$0 sm:$0xff] }
 0xf18   : > { %v2299_v0 = vsel %vm1197_vm6, %v2297_v61, %v3288_v60  ;;  %v2298_v3 = vsel %vm1197_vm6, %v2296_v62, %v3287_v34 }
 0xf19   : > { %v2300_v2 = vpack.c.bf16 %v2299_v0, %v2298_v3 }
 0xf1b   : > { %3203 = vmatmul.mubr.msk.bf16.vlgmr.msra.gmra.mxu0 %vm499_vm2, %v2300_v2 }
 0xf1c   : > { %3230 = vmatprep.mubr.msk.bf16.mxu0 %vm3435_vm0, %v3434_v1  ;;  %3215 = vmatpush3.bf16.msra.mxu0 %v3322_v13 }
 0xf1d   : > { %3216 = vmatprep.subr.bf16.mxu0 %v3434_v1 }
 0xf20   : > { %3217 = vmatpush3.bf16.msra.mxu0 %v3323_v19 }
 0xf21   : > { %3218 = vmatprep.subr.bf16.mxu0 %v3434_v1 }
 0xf24   : > { %3219 = vmatpush3.bf16.msra.mxu0 %v3324_v54 }
 0xf25   : > { %3220 = vmatprep.subr.bf16.mxu0 %v3434_v1 }
 0xf28   : > { %3221 = vmatpush3.bf16.msra.mxu0 %v3325_v52 }
 0xf29   : > { %3222 = vmatprep.subr.bf16.mxu0 %v3434_v1 }
 0xf2c   : > { %3223 = vmatpush3.bf16.msra.mxu0 %v3326_v44 }
 0xf2d   : > { %3224 = vmatprep.subr.bf16.mxu0 %v3434_v1 }
 0xf30   : > { %3225 = vmatpush3.bf16.msra.mxu0 %v3327_v49 }
 0xf31   : > { %3226 = vmatprep.subr.bf16.mxu0 %v3434_v1 }
 0xf34   : > { %3227 = vmatpush3.bf16.msra.mxu0 %v3328_v55 }
 0xf35   : > { %3228 = vmatprep.subr.bf16.mxu0 %v3434_v1 }
 0xf38   : > { %3229 = vmatpush3.bf16.msra.mxu0 %v3329_v56 }
 0xfdb   : > { %v2359_v15 = vpop.f32.mrf.mxu0 }
 0xfdc   : > { %v2360_v28 = vadd.f32 %v2359_v15, %v2309_v23 }
 0xfdd   : > { %v3204_v4 = vpop.f32.mrf.mxu0 }
 0xfde   : > { %v2366_v5 = vadd.f32 %v2360_v28, %v3803_v31 }
 0xfdf   : > { %v2362_v29 = vpop.f32.mrf.mxu0 }
 0xfe0   : > { %v2363_v16 = vadd.f32 %v2362_v29, %v2309_v23  ;;  %v2368_v6 = vsel %vm499_vm2, %v2366_v5, 0.0 }
 0xfe1   : > { %2369 = vadd.xlane.f32.xlu0 %v2368_v6  ;;  %v3205_v63 = vpop.f32.mrf.mxu0 }
 0xfe2   : > { %v2367_v7 = vadd.f32 %v2363_v16, %v3805_v32  ;;  %v3320_v32 = vld [vmem:[%s4041_s5 + $0x18] sm:$0xff]  }
 0xfe3   : > { %3207 = vmatpush3.bf16.msra.mxu1 %v3320_v32 }
 0xfe4   : > { %v2371_v8 = vsel %vm499_vm2, %v2367_v7, 0.0  ;;  %3208 = vmatprep.subr.bf16.mxu1 %v3434_v1 }
 0xfe5   : > { %2372 = vadd.xlane.f32.xlu1 %v2371_v8 }
 0xfe7   : > { %3209 = vmatpush3.bf16.msra.mxu1 %v3321_v25 }
 0xfe8   : > { %3234 = vmatprep.subr.bf16.mxu1 %v3434_v1 }
0x106a   : > { %v2370_v9 = vpop.xlane.xlu0 %2369 }
0x106b   : > { %v2374_v10 = vmul.f32 0.03125, %v2370_v9 }
0x106d   : > { %v2376_v11 = vsub.f32 %v2366_v5, %v2374_v10 }
0x106e   : > { %v2373_v47 = vpop.xlane.xlu1 %2372 }
0x106f   : > { %v2375_v14 = vmul.f32 0.03125, %v2373_v47  ;;  %v2378_v17 = vmul.f32 %v2376_v11, %v2376_v11 }
0x1071   : > { %v2377_v18 = vsub.f32 %v2367_v7, %v2375_v14  ;;  %v2380_v31 = vsel %vm499_vm2, %v2378_v17, 0.0 }
0x1072   : > { %2381 = vadd.xlane.f32.xlu0 %v2380_v31 }
0x1073   : > { %v2379_v20 = vmul.f32 %v2377_v18, %v2377_v18 }
0x1075   : > { %v2383_v21 = vsel %vm499_vm2, %v2379_v20, 0.0 }
0x1076   : > { %2384 = vadd.xlane.f32.xlu0 %v2383_v21 }
0x10fb   : > { %v2382_v26 = vpop.xlane.xlu0 %2381 }
0x10fc   : > { %v2386_v27 = vmul.f32 0.03125, %v2382_v26 }
0x10fe   : > { %v2388_v30 = vadd.f32 1e-05, %v2386_v27 }
0x10ff   : > { %v2385_v24 = vpop.xlane.xlu0 %2384 }
0x1100   : > { %3412 = vrsqrt.f32 %v2388_v30  ;;  %v2387_v33 = vmul.f32 0.03125, %v2385_v24 }
0x1102   : > { %v2389_v35 = vadd.f32 1e-05, %v2387_v33 }
0x1104   : > { %3414 = vrsqrt.f32 %v2389_v35 }
0x110d   : > { %v3413_v36 = vpop.eup %3412 }
0x110e   : > { %v2392_v38 = vmul.f32 %v3413_v36, %v2376_v11 }
0x1110   : > { %v2398_v45 = vmul.f32 %v2397_v41, %v2392_v38 }
0x1111   : > { %v3415_v42 = vpop.eup %3414 }
0x1112   : > { %v2393_v43 = vmul.f32 %v3415_v42, %v2377_v18  ;;  %v2404_v50 = vadd.f32 %v2403_v37, %v2398_v45 }
0x1114   : > { %v2399_v48 = vmul.f32 %v2397_v41, %v2393_v43 }
0x1116   : > { %v3965_v46 = vadd.f32 %v2403_v37, %v2399_v48 }
0x1118   : > { %v2406_v53 = vpack.c.bf16 %v3965_v46, %v2404_v50 }
0x111a   : > { %3211 = vmatmul.mubr.msk.bf16.vlgmr.msra.gmra.mxu1 %vm499_vm2, %v2406_v53 }
0x111b   : > { %3238 = vmatprep.mubr.msk.bf16.mxu1 %vm3435_vm0, %v3434_v1 }
0x11da   : > { %v2469_v58 = vpop.f32.mrf.mxu1 }
0x11db   : > { %v2470_v59 = vadd.f32 %v2883_v57, %v2469_v58 }
0x11dc   : > { %v3212_v60 = vpop.f32.mrf.mxu1 }
0x11dd   : > { %v2478_v34 = vmul.f32 0.70710677, %v2470_v59  ;;  %v2476_v52 = vmul.f32 0.5, %v2470_v59  ;;  %v2551_v60 = vrot.slane %v3837_v40, %v1447_v51  ;;  %v3330_v51 = vld [vmem:[%s4045_s9 + $0x8] sm:$0xff]  }
0x11de   : > { %v2472_v61 = vpop.f32.mrf.mxu1  ;;  %3235 = vmatpush3.bf16.msra.mxu1 %v3330_v51 }
0x11df   : > { %v2480_v62 = vand.u32 2147483647, %v2478_v34  ;;  %v2473_v0 = vadd.f32 %v2883_v57, %v2472_v61  ;;  %vm2520_vm9 = vcmp.ge.f32.partialorder %v2478_v34, 0.0  ;;  %3236 = vmatprep.subr.bf16.mxu1 %v3434_v1 }
0x11e0   : > { %v3213_v3 = vpop.f32.mrf.mxu1 }
0x11e1   : > { %v2482_v2 = vmul.f32 0.3275911, %v2480_v62  ;;  %v2479_v23 = vmul.f32 0.70710677, %v2473_v0  ;;  %v2508_v29 = vsub.f32 0.0, %v2480_v62  ;;  %v2477_v44 = vmul.f32 0.5, %v2473_v0 }
0x11e3   : > { %v2484_v15 = vadd.f32 1.0, %v2482_v2  ;;  %v2481_v28 = vand.u32 2147483647, %v2479_v23  ;;  %v2510_v16 = vmul.f32 %v2508_v29, %v2480_v62  ;;  %vm2521_vm10 = vcmp.ge.f32.partialorder %v2479_v23, 0.0 }
0x11e5   : > { %3416 = vrcp.f32 %v2484_v15  ;;  %v2483_v4 = vmul.f32 0.3275911, %v2481_v28  ;;  %v2509_v6 = vsub.f32 0.0, %v2481_v28  ;;  %v2512_v8 = vmul.f32 1.442695, %v2510_v16 }
0x11e7   : > { %v2485_v5 = vadd.f32 1.0, %v2483_v4  ;;  %v2511_v9 = vmul.f32 %v2509_v6, %v2481_v28  ;;  %v2841_v6 = vld [vmem:[%s4043_s7 + $0x18] sm:$0xff] }
0x11e9   : > { %3418 = vrcp.f32 %v2485_v5  ;;  %v2514_v17 = vmul.f32 1.442695, %v2511_v9  ;;  %v3331_v5 = vld [vmem:[%s4045_s9] sm:$0xff]   ;;  %v2662_v9 = vrot.slane %v2841_v6, %v3602_v39 }
0x11ea   : > { %3420 = vpow2.f32 %v2512_v8  ;;  %3237 = vmatpush3.bf16.msra.mxu1 %v3331_v5 }
0x11eb   : > { %3422 = vpow2.f32 %v2514_v17 }
0x11f2   : > { %v3417_v63 = vpop.eup %3416 }
0x11f3   : > { %v2490_v7 = vmul.f32 1.0614054, %v3417_v63 }
0x11f5   : > { %v2492_v10 = vadd.f32 -1.4531521, %v2490_v7 }
0x11f6   : > { %v3419_v11 = vpop.eup %3418 }
0x11f7   : > { %v2494_v47 = vmul.f32 %v3417_v63, %v2492_v10  ;;  %v2491_v14 = vmul.f32 1.0614054, %v3419_v11  ;;  %v3421_v36 = vpop.eup %3420 }
0x11f8   : > { %v3423_v45 = vpop.eup %3422 }
0x11f9   : > { %v2496_v18 = vadd.f32 1.4214138, %v2494_v47  ;;  %v2493_v31 = vadd.f32 -1.4531521, %v2491_v14  ;;  %v2911_v47 = vld [vmem:[%s4046_s10] ss:$0 sm:$0xff] }
0x11fb   : > { %v2498_v20 = vmul.f32 %v3417_v63, %v2496_v18  ;;  %v2495_v21 = vmul.f32 %v3419_v11, %v2493_v31 }
0x11fd   : > { %v2500_v32 = vadd.f32 -0.28449672, %v2498_v20  ;;  %v2497_v25 = vadd.f32 1.4214138, %v2495_v21 }
0x11ff   : > { %v2502_v26 = vmul.f32 %v3417_v63, %v2500_v32  ;;  %v2499_v27 = vmul.f32 %v3419_v11, %v2497_v25 }
0x1201   : > { %v2504_v30 = vadd.f32 0.2548296, %v2502_v26  ;;  %v2501_v24 = vadd.f32 -0.28449672, %v2499_v27 }
0x1203   : > { %v2506_v33 = vmul.f32 %v3417_v63, %v2504_v30  ;;  %v2503_v35 = vmul.f32 %v3419_v11, %v2501_v24  ;;  %v2657_v63 = vrot.slane %v3837_v40, %v1568_v12 }
0x1205   : > { %v2516_v38 = vmul.f32 %v3421_v36, %v2506_v33  ;;  %v2505_v41 = vadd.f32 0.2548296, %v2503_v35 }
0x1207   : > { %v2518_v42 = vsub.f32 1.0, %v2516_v38  ;;  %v2507_v43 = vmul.f32 %v3419_v11, %v2505_v41 }
0x1209   : > { %v2522_v37 = vsub.f32 0.0, %v2518_v42  ;;  %v2517_v48 = vmul.f32 %v3423_v45, %v2507_v43 }
0x120b   : > { %v2524_v50 = vsel %vm2520_vm9, %v2518_v42, %v2522_v37  ;;  %v2519_v53 = vsub.f32 1.0, %v2517_v48 }
0x120c   : > { %v2526_v19 = vadd.f32 1.0, %v2524_v50 }
0x120d   : > { %v2523_v13 = vsub.f32 0.0, %v2519_v53 }
0x120e   : > { %v2528_v55 = vmul.f32 %v2526_v19, %v2476_v52 }
0x120f   : > { %v2525_v54 = vsel %vm2521_vm10, %v2519_v53, %v2523_v13 }
0x1210   : > { %v2527_v49 = vadd.f32 1.0, %v2525_v54 }
0x1212   : > { %v2529_v56 = vmul.f32 %v2527_v49, %v2477_v44 }
0x1214   : > { %v2530_v57 = vpack.c.bf16 %v2529_v56, %v2528_v55 }
0x1216   : > { %3231 = vmatmul.mubr.bf16.vlgmr.msra.gmra.mxu0 %v2530_v57 }
0x12d6   : > { %v2634_v58 = vpop.f32.mrf.mxu0 }
0x12d8   : > { %v3232_v61 = vpop.f32.mrf.mxu0 }
0x12da   : > { %v2636_v34 = vpop.f32.mrf.mxu0 }
0x12db   : > { %v2637_v62 = vadd.f32 %v2636_v34, %v2551_v60 }
0x12dc   : > { %v3233_v3 = vpop.f32.mrf.mxu0 }
0x12dd   : > { %v2640_v2 = vadd.f32 %v2637_v62, %v3965_v46 }
0x12df   : > { %v2641_v23 = vsel %vm499_vm2, %v2640_v2, 0.0 }
0x12e0   : > { %2642 = vadd.xlane.f32.xlu1 %v2641_v23 }
0x1369   : > { %v2643_v59 = vpop.xlane.xlu1 %2642 }
0x136a   : > { %v2644_v0 = vmul.f32 0.03125, %v2643_v59 }
0x136c   : > { %v2645_v15 = vsub.f32 %v2640_v2, %v2644_v0 }
0x136e   : > { %v2646_v28 = vmul.f32 %v2645_v15, %v2645_v15 }
0x1370   : > { %v2647_v4 = vsel %vm499_vm2, %v2646_v28, 0.0 }
0x1371   : > { %2648 = vadd.xlane.f32.xlu0 %v2647_v4 }
0x13fa   : > { %v2649_v46 = vpop.xlane.xlu0 %2648 }
0x13fb   : > { %v2650_v29 = vmul.f32 0.03125, %v2649_v46 }
0x13fd   : > { %v2651_v16 = vadd.f32 1e-05, %v2650_v29 }
0x13ff   : > { %3424 = vrsqrt.f32 %v2651_v16 }
0x140c   : > { %v3425_v7 = vpop.eup %3424 }
0x140d   : > { %v2653_v8 = vmul.f32 %v3425_v7, %v2645_v15 }
0x140f   : > { %v2658_v10 = vmul.f32 %v2657_v63, %v2653_v8 }
0x1411   : > { %v2663_v11 = vadd.f32 %v2662_v9, %v2658_v10 }
0x1413   : > { %v2664_v1 = vpack.c.bf16 %v2663_v11, %v2663_v11 }
0x1415   : > { %3239 = vmatmul.mubr.msk.bf16.vlgmr.msra.gmra.mxu1 %vm499_vm2, %v2664_v1 }
0x14d5   : > { %v2725_v22 = vpop.f32.mrf.mxu1 }
0x14d6   : > { %v2726_v12 = vadd.f32 %v2911_v47, %v2725_v22 }
0x14d7   : > { %v3240_v40 = vpop.f32.mrf.mxu1 }
0x14d8   : > { %2732 = vst.msk [vmem:[%s384_s30] sm:$0xf] %vm2731_vm11, %v2726_v12 }
0x14d9   : > { %v2728_v39 = vpop.f32.mrf.mxu1 }
0x14db   : > { %v3241_v14 = vpop.f32.mrf.mxu1 }
0x14dc PF: > { %s21_s17 = sadd.s32 1, %s3432_s17  }
0x14dd   : > { %p18_p4 = scmp.ge.s32.totalorder %s21_s17, 4  }
0x14df   :  { %20 = sbr.rel (!%p18_p4) target bundleno = 1 (0x1), region = 104 }

</bundles_post_ra>
